<compile_context>
chip_gen: v6e
topology: v6e:2x2x1
jax: 0.10.0
libtpu: 0.0.40
codegen_flags: <defaults>
</compile_context>

<pallas_src>
import math

import jax
import jax.numpy as jnp
from jax import lax
from jax.experimental import pallas as pl
from jax.experimental.pallas import tpu as pltpu

EPS = 1e-5            # torch BatchNorm2d default
C_IN, C_OUT, KS = 3, 6, 5
OH = 14               # pooled output height == width
HW = OH * OH          # 196 valid spatial positions per sample
S_PAD = 256           # per-sample spatial footprint padded to lane-tile multiple


def fused_net_kernel(xcol_ref, w_ref, bn_ref, fcw_ref, fcb_ref, out_ref):
    """Fused conv (one wide im2col matmul) + BN (batch stats) + ReLU + maxpool + FC.

    xcol_ref : (75, 4*N*S_PAD)  im2col, columns ordered (phase, n, s_pad);
                                pad columns are zero.
    w_ref    : (6, 75)          conv weights, cols ordered (cin, kh, kw)
    bn_ref   : (6, 2)           [:, 0] = gamma, [:, 1] = beta
    fcw_ref  : (6*S_PAD, 10)    rows ordered (c, s_pad); pad rows are zero
    fcb_ref  : (1, 10)
    out_ref  : (N, 10)
    """
    nb = out_ref.shape[0]
    cc = w_ref.shape[0]                       # 6 channels
    sp = fcw_ref.shape[0] // cc               # S_PAD (256)
    ns = nb * sp                              # per-phase slab width (128-aligned)
    cnt = float(4 * nb * HW)                  # true BN element count = N*28*28

    # ---- Conv: single wide MXU matmul covering all 4 pooling phases --------
    y = jnp.dot(w_ref[...], xcol_ref[...],
                preferred_element_type=jnp.float32)          # (6, 4*N*S_PAD)

    # ---- BatchNorm2d (train mode), one-pass batch stats ---------------------
    # Zero pad columns contribute 0 to both sums; divide by the true count.
    sum_y = jnp.sum(y, axis=-1, keepdims=True)               # (6, 1)
    sum_y2 = jnp.sum(y * y, axis=-1, keepdims=True)          # (6, 1)
    mean = sum_y / cnt
    var = sum_y2 / cnt - mean * mean                         # biased variance
    gamma = bn_ref[:, 0:1]
    beta = bn_ref[:, 1:2]
    scale = lax.rsqrt(var + EPS) * gamma                     # (6, 1)
    shift = beta - mean * scale                              # (6, 1)

    # ---- affine, 2x2/2 max-pool (max over 4 aligned phase slabs), ReLU ------
    def slab(p):
        return y[:, p * ns:(p + 1) * ns] * scale + shift     # (6, N*S_PAD)

    pooled = jnp.maximum(jnp.maximum(slab(0), slab(1)),
                         jnp.maximum(slab(2), slab(3)))
    pooled = jnp.maximum(pooled, 0.0)          # relu(max(.)) == max(relu(.))

    # ---- FC: assemble sample-major (N, 6*S_PAD) rows from aligned views and
    #      do ONE MXU matmul with K = 6*S_PAD.  fcw pad rows are zero, so the
    #      junk values living in pad lanes of `pooled` never reach the output.
    rows = [jnp.concatenate([pooled[c:c + 1, n * sp:(n + 1) * sp]
                             for c in range(cc)], axis=1)    # (1, 6*S_PAD)
            for n in range(nb)]
    a = jnp.concatenate(rows, axis=0)                        # (N, 6*S_PAD)
    out = jnp.dot(a, fcw_ref[...],
                  preferred_element_type=jnp.float32) + fcb_ref[...]
    out_ref[...] = out.astype(out_ref.dtype)


def net_forward(x_nchw, params):
    conv_w = params["conv_w"]   # (6, 3, 5, 5)  torch OIHW
    gamma = params["gamma"]     # (6,)
    beta = params["beta"]       # (6,)
    fc_w = params["fc_w"]       # (10, 1176)    torch (out, in), in = (c, i, j)
    fc_b = params["fc_b"]       # (10,)
    # conv_b intentionally unused: cancelled exactly by train-mode BatchNorm.

    n = x_nchw.shape[0]

    # ---- im2col in ONE op: patches[n, ci*25+kh*5+kw, h, w] = x[n,ci,h+kh,w+kw]
    patches = lax.conv_general_dilated_patches(
        x_nchw, filter_shape=(KS, KS), window_strides=(1, 1), padding="VALID",
        dimension_numbers=("NCHW", "OIHW", "NCHW"),
        precision=lax.Precision.HIGHEST)                     # (N, 75, 28, 28)

    # Regroup into the 4 max-pool phases, zero-pad 196 -> 256 lanes per sample,
    # and lay columns out phase-major so all in-kernel slices are 128-aligned.
    p = patches.reshape(n, C_IN * KS * KS, OH, 2, OH, 2)     # (n, r, i, pa, j, pb)
    p = jnp.transpose(p, (1, 3, 5, 0, 2, 4))                 # (r, pa, pb, n, i, j)
    p = p.reshape(C_IN * KS * KS, 4, n, HW)
    p = jnp.pad(p, ((0, 0), (0, 0), (0, 0), (0, S_PAD - HW)))
    xcol = p.reshape(C_IN * KS * KS, 4 * n * S_PAD)          # (75, 4*N*256)

    # Conv weights: (cout, (cin, kh, kw)) — matches the patches channel order.
    w_mat = conv_w.reshape(C_OUT, C_IN * KS * KS)            # (6, 75)

    bn = jnp.stack([gamma, beta], axis=1)                    # (6, 2)

    # FC weights: (10, (c, 196)) -> zero-pad spatial to 256 -> ((c, 256), 10)
    fcw = jnp.pad(fc_w.reshape(10, C_OUT, HW),
                  ((0, 0), (0, 0), (0, S_PAD - HW)))
    fcw_flat = jnp.transpose(fcw, (1, 2, 0)).reshape(C_OUT * S_PAD, 10)

    vmem = pl.BlockSpec(memory_space=pltpu.MemorySpace.VMEM)
    out = pl.pallas_call(
        fused_net_kernel,
        out_shape=jax.ShapeDtypeStruct((n, 10), jnp.float32),
        in_specs=[vmem] * 5,
        out_specs=vmem,
    )(xcol, w_mat, bn, fcw_flat, fc_b.reshape(1, 10))
    return out


def ref_forward(x_nchw, params):
    """Pure-JAX reference (same semantics as torch forward in train mode)."""
    conv_w, conv_b = params["conv_w"], params["conv_b"]
    gamma, beta = params["gamma"], params["beta"]
    fc_w, fc_b = params["fc_w"], params["fc_b"]
    n = x_nchw.shape[0]
    y = lax.conv_general_dilated(x_nchw, conv_w, (1, 1), "VALID",
                                 dimension_numbers=("NCHW", "OIHW", "NCHW"))
    y = y + conv_b[None, :, None, None]
    mean = jnp.mean(y, axis=(0, 2, 3))
    var = jnp.mean((y - mean[None, :, None, None]) ** 2, axis=(0, 2, 3))
    y = (y - mean[None, :, None, None]) * lax.rsqrt(var + EPS)[None, :, None, None]
    y = y * gamma[None, :, None, None] + beta[None, :, None, None]
    y = jnp.maximum(y, 0.0)
    y = y.reshape(n, 6, 14, 2, 14, 2).max(axis=(3, 5))
    return y.reshape(n, -1) @ fc_w.T + fc_b


if __name__ == "__main__":
    key = jax.random.PRNGKey(0)
    kx, kw1, kb1, kw2, kb2 = jax.random.split(key, 5)
    fan_conv = 3 * 5 * 5
    fan_fc = 6 * 14 * 14
    params = dict(
        conv_w=jax.random.uniform(kw1, (6, 3, 5, 5), jnp.float32,
                                  -1.0 / math.sqrt(fan_conv),
                                  1.0 / math.sqrt(fan_conv)),
        conv_b=jax.random.uniform(kb1, (6,), jnp.float32,
                                  -1.0 / math.sqrt(fan_conv),
                                  1.0 / math.sqrt(fan_conv)),
        gamma=jnp.ones((6,), jnp.float32),
        beta=jnp.zeros((6,), jnp.float32),
        fc_w=jax.random.uniform(kw2, (10, fan_fc), jnp.float32,
                                -1.0 / math.sqrt(fan_fc),
                                1.0 / math.sqrt(fan_fc)),
        fc_b=jax.random.uniform(kb2, (10,), jnp.float32,
                                -1.0 / math.sqrt(fan_fc),
                                1.0 / math.sqrt(fan_fc)),
    )
    x = jax.random.normal(kx, (2, 3, 32, 32), jnp.float32)

    out = jax.jit(net_forward)(x, params)
    out = jax.block_until_ready(out)

    ref = ref_forward(x, params)
    assert out.shape == (2, 10), out.shape
    assert jnp.allclose(out, ref, atol=1e-3, rtol=1e-3), (out, ref)
    print("KERNEL_OK")
</pallas_src>

<mosaic_0001>
module attributes {stable_mosaic.version = 11 : i64} {
  func.func @fused_net_kernel(%arg0: memref<75x2048xf32, #tpu.memory_space<vmem>>, %arg1: memref<6x75xf32, #tpu.memory_space<vmem>>, %arg2: memref<6x2xf32, #tpu.memory_space<vmem>>, %arg3: memref<1536x10xf32, #tpu.memory_space<vmem>>, %arg4: memref<1x10xf32, #tpu.memory_space<vmem>>, %arg5: memref<2x10xf32, #tpu.memory_space<vmem>>) attributes {dimension_semantics = [], scalar_prefetch = 0 : i64, scratch_operands = 0 : i64, tpu.core_type = #tpu.core_type<tc>} {
    %c0 = arith.constant 0 : index
    %c0_0 = arith.constant 0 : index
    %0 = vector.load %arg1[%c0, %c0_0] : memref<6x75xf32, #tpu.memory_space<vmem>>, vector<6x75xf32>
    %c0_1 = arith.constant 0 : index
    %c0_2 = arith.constant 0 : index
    %1 = vector.load %arg0[%c0_1, %c0_2] : memref<75x2048xf32, #tpu.memory_space<vmem>>, vector<75x2048xf32>
    %cst = arith.constant dense<0.000000e+00> : vector<6x2048xf32>
    %2 = tpu.matmul %0, %1, %cst {dimension_numbers = #tpu.dot_dimension_numbers<[1], [0], [0], [1], [0, 0, 1, 1], [], []>} : vector<6x75xf32>, vector<75x2048xf32>, vector<6x2048xf32> -> vector<6x2048xf32>
    %cst_3 = arith.constant dense<0.000000e+00> : vector<6xf32>
    %3 = vector.multi_reduction <add>, %2, %cst_3 [1] : vector<6x2048xf32> to vector<6xf32>
    %4 = vector.shape_cast %3 : vector<6xf32> to vector<6x1xf32>
    %5 = arith.mulf %2, %2 : vector<6x2048xf32>
    %cst_4 = arith.constant dense<0.000000e+00> : vector<6xf32>
    %6 = vector.multi_reduction <add>, %5, %cst_4 [1] : vector<6x2048xf32> to vector<6xf32>
    %7 = vector.shape_cast %6 : vector<6xf32> to vector<6x1xf32>
    %cst_5 = arith.constant 1.568000e+03 : f32
    %8 = vector.broadcast %cst_5 : f32 to vector<6x1xf32>
    %9 = arith.divf %4, %8 : vector<6x1xf32>
    %cst_6 = arith.constant 1.568000e+03 : f32
    %10 = vector.broadcast %cst_6 : f32 to vector<6x1xf32>
    %11 = arith.divf %7, %10 : vector<6x1xf32>
    %12 = arith.mulf %9, %9 : vector<6x1xf32>
    %13 = arith.subf %11, %12 : vector<6x1xf32>
    %c0_7 = arith.constant 0 : index
    %c0_8 = arith.constant 0 : index
    %14 = vector.load %arg2[%c0_7, %c0_8] : memref<6x2xf32, #tpu.memory_space<vmem>>, vector<6x1xf32>
    %c0_9 = arith.constant 0 : index
    %c1 = arith.constant 1 : index
    %15 = vector.load %arg2[%c0_9, %c1] : memref<6x2xf32, #tpu.memory_space<vmem>>, vector<6x1xf32>
    %cst_10 = arith.constant 9.99999974E-6 : f32
    %16 = vector.broadcast %cst_10 : f32 to vector<6x1xf32>
    %17 = arith.addf %13, %16 : vector<6x1xf32>
    %18 = math.rsqrt %17 : vector<6x1xf32>
    %19 = arith.mulf %18, %14 : vector<6x1xf32>
    %20 = arith.mulf %9, %19 : vector<6x1xf32>
    %21 = arith.subf %15, %20 : vector<6x1xf32>
    %22 = vector.extract_strided_slice %2 {offsets = [0, 0], sizes = [6, 512], strides = [1, 1]} : vector<6x2048xf32> to vector<6x512xf32>
    %23 = vector.broadcast %19 : vector<6x1xf32> to vector<6x512xf32>
    %24 = arith.mulf %22, %23 : vector<6x512xf32>
    %25 = vector.broadcast %21 : vector<6x1xf32> to vector<6x512xf32>
    %26 = arith.addf %24, %25 : vector<6x512xf32>
    %27 = vector.extract_strided_slice %2 {offsets = [0, 512], sizes = [6, 512], strides = [1, 1]} : vector<6x2048xf32> to vector<6x512xf32>
    %28 = vector.broadcast %19 : vector<6x1xf32> to vector<6x512xf32>
    %29 = arith.mulf %27, %28 : vector<6x512xf32>
    %30 = vector.broadcast %21 : vector<6x1xf32> to vector<6x512xf32>
    %31 = arith.addf %29, %30 : vector<6x512xf32>
    %32 = arith.maximumf %26, %31 : vector<6x512xf32>
    %33 = vector.extract_strided_slice %2 {offsets = [0, 1024], sizes = [6, 512], strides = [1, 1]} : vector<6x2048xf32> to vector<6x512xf32>
    %34 = vector.broadcast %19 : vector<6x1xf32> to vector<6x512xf32>
    %35 = arith.mulf %33, %34 : vector<6x512xf32>
    %36 = vector.broadcast %21 : vector<6x1xf32> to vector<6x512xf32>
    %37 = arith.addf %35, %36 : vector<6x512xf32>
    %38 = vector.extract_strided_slice %2 {offsets = [0, 1536], sizes = [6, 512], strides = [1, 1]} : vector<6x2048xf32> to vector<6x512xf32>
    %39 = vector.broadcast %19 : vector<6x1xf32> to vector<6x512xf32>
    %40 = arith.mulf %38, %39 : vector<6x512xf32>
    %41 = vector.broadcast %21 : vector<6x1xf32> to vector<6x512xf32>
    %42 = arith.addf %40, %41 : vector<6x512xf32>
    %43 = arith.maximumf %37, %42 : vector<6x512xf32>
    %44 = arith.maximumf %32, %43 : vector<6x512xf32>
    %cst_11 = arith.constant 0.000000e+00 : f32
    %45 = vector.broadcast %cst_11 : f32 to vector<6x512xf32>
    %46 = arith.maximumf %44, %45 : vector<6x512xf32>
    %47 = vector.extract_strided_slice %46 {offsets = [0, 0], sizes = [1, 256], strides = [1, 1]} : vector<6x512xf32> to vector<1x256xf32>
    %48 = vector.extract_strided_slice %46 {offsets = [1, 0], sizes = [1, 256], strides = [1, 1]} : vector<6x512xf32> to vector<1x256xf32>
    %49 = vector.extract_strided_slice %46 {offsets = [2, 0], sizes = [1, 256], strides = [1, 1]} : vector<6x512xf32> to vector<1x256xf32>
    %50 = vector.extract_strided_slice %46 {offsets = [3, 0], sizes = [1, 256], strides = [1, 1]} : vector<6x512xf32> to vector<1x256xf32>
    %51 = vector.extract_strided_slice %46 {offsets = [4, 0], sizes = [1, 256], strides = [1, 1]} : vector<6x512xf32> to vector<1x256xf32>
    %52 = vector.extract_strided_slice %46 {offsets = [5, 0], sizes = [1, 256], strides = [1, 1]} : vector<6x512xf32> to vector<1x256xf32>
    %53 = tpu.concatenate %47, %48, %49, %50, %51, %52 in 1 : vector<1x256xf32>, vector<1x256xf32>, vector<1x256xf32>, vector<1x256xf32>, vector<1x256xf32>, vector<1x256xf32> -> vector<1x1536xf32>
    %54 = vector.extract_strided_slice %46 {offsets = [0, 256], sizes = [1, 256], strides = [1, 1]} : vector<6x512xf32> to vector<1x256xf32>
    %55 = vector.extract_strided_slice %46 {offsets = [1, 256], sizes = [1, 256], strides = [1, 1]} : vector<6x512xf32> to vector<1x256xf32>
    %56 = vector.extract_strided_slice %46 {offsets = [2, 256], sizes = [1, 256], strides = [1, 1]} : vector<6x512xf32> to vector<1x256xf32>
    %57 = vector.extract_strided_slice %46 {offsets = [3, 256], sizes = [1, 256], strides = [1, 1]} : vector<6x512xf32> to vector<1x256xf32>
    %58 = vector.extract_strided_slice %46 {offsets = [4, 256], sizes = [1, 256], strides = [1, 1]} : vector<6x512xf32> to vector<1x256xf32>
    %59 = vector.extract_strided_slice %46 {offsets = [5, 256], sizes = [1, 256], strides = [1, 1]} : vector<6x512xf32> to vector<1x256xf32>
    %60 = tpu.concatenate %54, %55, %56, %57, %58, %59 in 1 : vector<1x256xf32>, vector<1x256xf32>, vector<1x256xf32>, vector<1x256xf32>, vector<1x256xf32>, vector<1x256xf32> -> vector<1x1536xf32>
    %61 = tpu.concatenate %53, %60 in 0 : vector<1x1536xf32>, vector<1x1536xf32> -> vector<2x1536xf32>
    %c0_12 = arith.constant 0 : index
    %c0_13 = arith.constant 0 : index
    %62 = vector.load %arg3[%c0_12, %c0_13] : memref<1536x10xf32, #tpu.memory_space<vmem>>, vector<1536x10xf32>
    %cst_14 = arith.constant dense<0.000000e+00> : vector<2x10xf32>
    %63 = tpu.matmul %61, %62, %cst_14 {dimension_numbers = #tpu.dot_dimension_numbers<[1], [0], [0], [1], [0, 0, 1, 1], [], []>} : vector<2x1536xf32>, vector<1536x10xf32>, vector<2x10xf32> -> vector<2x10xf32>
    %c0_15 = arith.constant 0 : index
    %c0_16 = arith.constant 0 : index
    %64 = vector.load %arg4[%c0_15, %c0_16] : memref<1x10xf32, #tpu.memory_space<vmem>>, vector<1x10xf32>
    %65 = vector.broadcast %64 : vector<1x10xf32> to vector<2x10xf32>
    %66 = arith.addf %63, %65 : vector<2x10xf32>
    %c0_17 = arith.constant 0 : index
    %c0_18 = arith.constant 0 : index
    %67 = vector.load %arg5[%c0_17, %c0_18] : memref<2x10xf32, #tpu.memory_space<vmem>>, vector<2x10xf32>
    tpu.vector_store %arg5[%c0_17, %c0_18], %66 {strides = array<i32>} : memref<2x10xf32, #tpu.memory_space<vmem>>, vector<2x10xf32>,
    return
  }
}

</mosaic_0001>

<bundles_post_ra>
// kernel: net_forward.1
= control target key start
LH: loop header
LB: loop body
LE: loop exit
PB: predicated region body
PF: predicated region fallthrough
CT: control target
= control target key end

     0   :  { %vm186_vm0 = vcmask 1042432   ;;  %vm182_vm1 = vcmask 613376   ;;  %v1941_v40 = vmov 0.0   ;;  %s3268_s0 = inlined_call_operand.vmem [shape: f32[75,2048], index: 0, kind: input, shape index: {}]   ;;  %s3269_s1 = inlined_call_operand.vmem [shape: f32[6,75], index: 1, kind: input, shape index: {}]   ;;  %s3270_s2 = inlined_call_operand.vmem [shape: f32[6,2], index: 2, kind: input, shape index: {}]   ;;  %s3271_s3 = inlined_call_operand.vmem [shape: f32[1536,10], index: 3, kind: input, shape index: {}]   ;;  %s3272_s4 = inlined_call_operand.vmem [shape: f32[1,10], index: 4, kind: input, shape index: {}]   ;;  %s3273_s5 = inlined_call_operand.hbm [shape: f32[2,10], index: 5, kind: output, shape index: {}]  }
   0x1   :  { %v167_v0 = vld [vmem:[%s3268_s0 + $0x488] sm:$0x7]  ;;  %v166_v1 = vld [vmem:[%s3268_s0 + $0x480] sm:$0x7]  ;;  %v169_v3 = vld [vmem:[%s3268_s0 + $0x498] sm:$0x7]  ;;  %299 = vmatprep.mubr.f32.mxu0 %v1941_v40  ;;  %370 = vmatprep.mubr.f32.mxu1 %v1941_v40 }
   0x2   :  { %v151_v2 = vld [vmem:[%s3268_s0 + $0x408] sm:$0xff]  ;;  %1665 = vmatprep.subr.msk.mxu0 %vm186_vm0, %v167_v0  ;;  %v150_v4 = vld [vmem:[%s3268_s0 + $0x400] sm:$0xff]  ;;  %v168_v5 = vld [vmem:[%s3268_s0 + $0x490] sm:$0x7]  ;;  %1668 = vmatprep.subr.msk.mxu1 %vm186_vm0, %v169_v3 }
   0x3   :  { %1666 = vmatpush1.msk.msra.mxu0 %vm186_vm0, %v166_v1  ;;  %v135_v6 = vld [vmem:[%s3268_s0 + $0x388] sm:$0xff]  ;;  %v153_v7 = vld [vmem:[%s3268_s0 + $0x418] sm:$0xff]  ;;  %1669 = vmatpush1.msk.msra.mxu1 %vm186_vm0, %v168_v5  ;;  %v134_v8 = vld [vmem:[%s3268_s0 + $0x380] sm:$0xff] }
   0x4   :  { %249 = vmatprep.subr.mxu0 %v151_v2  ;;  %v152_v9 = vld [vmem:[%s3268_s0 + $0x410] sm:$0xff]  ;;  %v137_v10 = vld [vmem:[%s3268_s0 + $0x398] sm:$0xff]  ;;  %320 = vmatprep.subr.mxu1 %v153_v7  ;;  %v119_v11 = vld [vmem:[%s3268_s0 + $0x308] sm:$0xff] }
   0x5   :  { %250 = vmatpush1.msra.mxu0 %v150_v4  ;;  %v136_v12 = vld [vmem:[%s3268_s0 + $0x390] sm:$0xff]  ;;  %321 = vmatpush1.msra.mxu1 %v152_v9  ;;  %v118_v13 = vld [vmem:[%s3268_s0 + $0x300] sm:$0xff]  ;;  %v121_v14 = vld [vmem:[%s3268_s0 + $0x318] sm:$0xff] }
   0x6   :  { %251 = vmatprep.subr.mxu0 %v135_v6  ;;  %322 = vmatprep.subr.mxu1 %v137_v10  ;;  %v103_v15 = vld [vmem:[%s3268_s0 + $0x288] sm:$0xff]  ;;  %v120_v16 = vld [vmem:[%s3268_s0 + $0x310] sm:$0xff]  ;;  %v102_v17 = vld [vmem:[%s3268_s0 + $0x280] sm:$0xff] }
   0x7   :  { %252 = vmatpush1.msra.mxu0 %v134_v8  ;;  %323 = vmatpush1.msra.mxu1 %v136_v12  ;;  %v105_v18 = vld [vmem:[%s3268_s0 + $0x298] sm:$0xff]  ;;  %v87_v19 = vld [vmem:[%s3268_s0 + $0x208] sm:$0xff]  ;;  %v104_v20 = vld [vmem:[%s3268_s0 + $0x290] sm:$0xff] }
   0x8   :  { %253 = vmatprep.subr.mxu0 %v119_v11  ;;  %324 = vmatprep.subr.mxu1 %v121_v14  ;;  %v86_v21 = vld [vmem:[%s3268_s0 + $0x200] sm:$0xff]  ;;  %v89_v22 = vld [vmem:[%s3268_s0 + $0x218] sm:$0xff]  ;;  %v71_v23 = vld [vmem:[%s3268_s0 + $0x188] sm:$0xff] }
   0x9   :  { %254 = vmatpush1.msra.mxu0 %v118_v13  ;;  %325 = vmatpush1.msra.mxu1 %v120_v16  ;;  %v88_v24 = vld [vmem:[%s3268_s0 + $0x210] sm:$0xff]  ;;  %v70_v25 = vld [vmem:[%s3268_s0 + $0x180] sm:$0xff]  ;;  %v73_v26 = vld [vmem:[%s3268_s0 + $0x198] sm:$0xff] }
   0xa   :  { %255 = vmatprep.subr.mxu0 %v103_v15  ;;  %326 = vmatprep.subr.mxu1 %v105_v18  ;;  %v55_v27 = vld [vmem:[%s3268_s0 + $0x108] sm:$0xff]  ;;  %v72_v28 = vld [vmem:[%s3268_s0 + $0x190] sm:$0xff]  ;;  %v54_v29 = vld [vmem:[%s3268_s0 + $0x100] sm:$0xff] }
   0xb   :  { %256 = vmatpush1.msra.mxu0 %v102_v17  ;;  %327 = vmatpush1.msra.mxu1 %v104_v20  ;;  %v57_v30 = vld [vmem:[%s3268_s0 + $0x118] sm:$0xff]  ;;  %v39_v31 = vld [vmem:[%s3268_s0 + $0x88] sm:$0xff]  ;;  %v56_v32 = vld [vmem:[%s3268_s0 + $0x110] sm:$0xff] }
   0xc   :  { %257 = vmatprep.subr.mxu0 %v87_v19  ;;  %328 = vmatprep.subr.mxu1 %v89_v22  ;;  %v38_v33 = vld [vmem:[%s3268_s0 + $0x80] sm:$0xff]  ;;  %v41_v34 = vld [vmem:[%s3268_s0 + $0x98] sm:$0xff]  ;;  %v23_v35 = vld [vmem:[%s3268_s0 + $0x8] sm:$0xff] }
   0xd   :  { %258 = vmatpush1.msra.mxu0 %v86_v21  ;;  %329 = vmatpush1.msra.mxu1 %v88_v24  ;;  %v22_v36 = vld [vmem:[%s3268_s0] sm:$0xff]  ;;  %v40_v37 = vld [vmem:[%s3268_s0 + $0x90] sm:$0xff]  ;;  %v25_v39 = vld [vmem:[%s3268_s0 + $0x18] sm:$0xff] }
   0xe   :  { %259 = vmatprep.subr.mxu0 %v71_v23  ;;  %330 = vmatprep.subr.mxu1 %v73_v26  ;;  %v2097_v38 = vld [vmem:[%s3269_s1] sm:$0x3f]  ;;  %v171_v41 = vld [vmem:[%s3268_s0 + $0x4a8] sm:$0x7]  ;;  %v24_v42 = vld [vmem:[%s3268_s0 + $0x10] sm:$0xff] }
   0xf   :  { %260 = vmatpush1.msra.mxu0 %v70_v25  ;;  %331 = vmatpush1.msra.mxu1 %v72_v28  ;;  %v170_v43 = vld [vmem:[%s3268_s0 + $0x4a0] sm:$0x7]  ;;  %v155_v44 = vld [vmem:[%s3268_s0 + $0x428] sm:$0xff]  ;;  %v173_v45 = vld [vmem:[%s3268_s0 + $0x4b8] sm:$0x7] }
  0x10   :  { %261 = vmatprep.subr.mxu0 %v55_v27  ;;  %332 = vmatprep.subr.mxu1 %v57_v30  ;;  %v154_v46 = vld [vmem:[%s3268_s0 + $0x420] sm:$0xff]  ;;  %v172_v47 = vld [vmem:[%s3268_s0 + $0x4b0] sm:$0x7]  ;;  %v139_v48 = vld [vmem:[%s3268_s0 + $0x3a8] sm:$0xff] }
  0x11   :  { %262 = vmatpush1.msra.mxu0 %v54_v29  ;;  %333 = vmatpush1.msra.mxu1 %v56_v32  ;;  %v157_v49 = vld [vmem:[%s3268_s0 + $0x438] sm:$0xff]  ;;  %v138_v50 = vld [vmem:[%s3268_s0 + $0x3a0] sm:$0xff]  ;;  %v156_v51 = vld [vmem:[%s3268_s0 + $0x430] sm:$0xff] }
  0x12   :  { %263 = vmatprep.subr.mxu0 %v39_v31  ;;  %334 = vmatprep.subr.mxu1 %v41_v34  ;;  %v123_v52 = vld [vmem:[%s3268_s0 + $0x328] sm:$0xff]  ;;  %v141_v53 = vld [vmem:[%s3268_s0 + $0x3b8] sm:$0xff]  ;;  %v122_v54 = vld [vmem:[%s3268_s0 + $0x320] sm:$0xff] }
  0x13   :  { %264 = vmatpush1.msra.mxu0 %v38_v33  ;;  %335 = vmatpush1.msra.mxu1 %v40_v37  ;;  %v140_v55 = vld [vmem:[%s3268_s0 + $0x3b0] sm:$0xff]  ;;  %v107_v56 = vld [vmem:[%s3268_s0 + $0x2a8] sm:$0xff]  ;;  %v125_v57 = vld [vmem:[%s3268_s0 + $0x338] sm:$0xff] }
  0x14   :  { %265 = vmatprep.subr.mxu0 %v23_v35  ;;  %336 = vmatprep.subr.mxu1 %v25_v39  ;;  %v106_v58 = vld [vmem:[%s3268_s0 + $0x2a0] sm:$0xff]  ;;  %v124_v59 = vld [vmem:[%s3268_s0 + $0x330] sm:$0xff]  ;;  %v91_v60 = vld [vmem:[%s3268_s0 + $0x228] sm:$0xff] }
  0x15   :  { %266 = vmatpush1.msra.mxu0 %v22_v36  ;;  %337 = vmatpush1.msra.mxu1 %v24_v42  ;;  %v109_v61 = vld [vmem:[%s3268_s0 + $0x2b8] sm:$0xff]  ;;  %v90_v62 = vld [vmem:[%s3268_s0 + $0x220] sm:$0xff]  ;;  %v108_v63 = vld [vmem:[%s3268_s0 + $0x2b0] sm:$0xff] }
  0x16   :  { %1667 = vmatmul.mubr.msk.f32.vlgmr.msra.gmra.mxu0 %vm182_vm1, %v2097_v38  ;;  %1671 = vmatprep.subr.msk.mxu0 %vm186_vm0, %v171_v41  ;;  %v75_v0 = vld [vmem:[%s3268_s0 + $0x1a8] sm:$0xff]  ;;  %v93_v1 = vld [vmem:[%s3268_s0 + $0x238] sm:$0xff]  ;;  %v74_v2 = vld [vmem:[%s3268_s0 + $0x1a0] sm:$0xff] }
  0x17   :  { %1672 = vmatpush1.msk.msra.mxu0 %vm186_vm0, %v170_v43  ;;  %1674 = vmatprep.subr.msk.mxu1 %vm186_vm0, %v173_v45  ;;  %v92_v3 = vld [vmem:[%s3268_s0 + $0x230] sm:$0xff]  ;;  %v59_v4 = vld [vmem:[%s3268_s0 + $0x128] sm:$0xff]  ;;  %v77_v5 = vld [vmem:[%s3268_s0 + $0x1b8] sm:$0xff] }
  0x18   :  { %391 = vmatprep.subr.mxu0 %v155_v44  ;;  %1670 = vmatmul.mubr.msk.f32.vlgmr.msra.gmra.mxu1 %vm182_vm1, %v2097_v38  ;;  %v58_v6 = vld [vmem:[%s3268_s0 + $0x120] sm:$0xff]  ;;  %v76_v7 = vld [vmem:[%s3268_s0 + $0x1b0] sm:$0xff]  ;;  %v43_v8 = vld [vmem:[%s3268_s0 + $0xa8] sm:$0xff] }
  0x19   :  { %392 = vmatpush1.msra.mxu0 %v154_v46  ;;  %1675 = vmatpush1.msk.msra.mxu1 %vm186_vm0, %v172_v47  ;;  %v61_v9 = vld [vmem:[%s3268_s0 + $0x138] sm:$0xff]  ;;  %v42_v10 = vld [vmem:[%s3268_s0 + $0xa0] sm:$0xff]  ;;  %v60_v11 = vld [vmem:[%s3268_s0 + $0x130] sm:$0xff] }
  0x1a   :  { %393 = vmatprep.subr.mxu0 %v139_v48  ;;  %462 = vmatprep.subr.mxu1 %v157_v49  ;;  %v27_v12 = vld [vmem:[%s3268_s0 + $0x28] sm:$0xff]  ;;  %v45_v13 = vld [vmem:[%s3268_s0 + $0xb8] sm:$0xff]  ;;  %v26_v14 = vld [vmem:[%s3268_s0 + $0x20] sm:$0xff] }
  0x1b   :  { %394 = vmatpush1.msra.mxu0 %v138_v50  ;;  %463 = vmatpush1.msra.mxu1 %v156_v51  ;;  %v44_v15 = vld [vmem:[%s3268_s0 + $0xb0] sm:$0xff]  ;;  %v29_v16 = vld [vmem:[%s3268_s0 + $0x38] sm:$0xff]  ;;  %v175_v17 = vld [vmem:[%s3268_s0 + $0x4c8] sm:$0x7] }
  0x1c   :  { %395 = vmatprep.subr.mxu0 %v123_v52  ;;  %464 = vmatprep.subr.mxu1 %v141_v53  ;;  %v28_v18 = vld [vmem:[%s3268_s0 + $0x30] sm:$0xff]  ;;  %v174_v19 = vld [vmem:[%s3268_s0 + $0x4c0] sm:$0x7]  ;;  %v159_v20 = vld [vmem:[%s3268_s0 + $0x448] sm:$0xff] }
  0x1d   :  { %396 = vmatpush1.msra.mxu0 %v122_v54  ;;  %465 = vmatpush1.msra.mxu1 %v140_v55  ;;  %v177_v21 = vld [vmem:[%s3268_s0 + $0x4d8] sm:$0x7]  ;;  %v158_v22 = vld [vmem:[%s3268_s0 + $0x440] sm:$0xff]  ;;  %v176_v23 = vld [vmem:[%s3268_s0 + $0x4d0] sm:$0x7] }
  0x1e   :  { %397 = vmatprep.subr.mxu0 %v107_v56  ;;  %466 = vmatprep.subr.mxu1 %v125_v57  ;;  %v143_v24 = vld [vmem:[%s3268_s0 + $0x3c8] sm:$0xff]  ;;  %v161_v25 = vld [vmem:[%s3268_s0 + $0x458] sm:$0xff]  ;;  %v142_v26 = vld [vmem:[%s3268_s0 + $0x3c0] sm:$0xff] }
  0x1f   :  { %398 = vmatpush1.msra.mxu0 %v106_v58  ;;  %467 = vmatpush1.msra.mxu1 %v124_v59  ;;  %v160_v27 = vld [vmem:[%s3268_s0 + $0x450] sm:$0xff]  ;;  %v127_v28 = vld [vmem:[%s3268_s0 + $0x348] sm:$0xff]  ;;  %v145_v29 = vld [vmem:[%s3268_s0 + $0x3d8] sm:$0xff] }
  0x20   :  { %399 = vmatprep.subr.mxu0 %v91_v60  ;;  %468 = vmatprep.subr.mxu1 %v109_v61  ;;  %v126_v30 = vld [vmem:[%s3268_s0 + $0x340] sm:$0xff]  ;;  %v144_v31 = vld [vmem:[%s3268_s0 + $0x3d0] sm:$0xff]  ;;  %v111_v32 = vld [vmem:[%s3268_s0 + $0x2c8] sm:$0xff] }
  0x21   :  { %400 = vmatpush1.msra.mxu0 %v90_v62  ;;  %469 = vmatpush1.msra.mxu1 %v108_v63  ;;  %v129_v33 = vld [vmem:[%s3268_s0 + $0x358] sm:$0xff]  ;;  %v110_v34 = vld [vmem:[%s3268_s0 + $0x2c0] sm:$0xff]  ;;  %v128_v35 = vld [vmem:[%s3268_s0 + $0x350] sm:$0xff] }
  0x22   :  { %401 = vmatprep.subr.mxu0 %v75_v0  ;;  %470 = vmatprep.subr.mxu1 %v93_v1  ;;  %v95_v36 = vld [vmem:[%s3268_s0 + $0x248] sm:$0xff]  ;;  %v113_v37 = vld [vmem:[%s3268_s0 + $0x2d8] sm:$0xff]  ;;  %v94_v39 = vld [vmem:[%s3268_s0 + $0x240] sm:$0xff] }
  0x23   :  { %402 = vmatpush1.msra.mxu0 %v74_v2  ;;  %471 = vmatpush1.msra.mxu1 %v92_v3  ;;  %v112_v41 = vld [vmem:[%s3268_s0 + $0x2d0] sm:$0xff]  ;;  %v79_v42 = vld [vmem:[%s3268_s0 + $0x1c8] sm:$0xff] }
  0x24   :  { %403 = vmatprep.subr.mxu0 %v59_v4  ;;  %472 = vmatprep.subr.mxu1 %v77_v5 }
  0x25   :  { %404 = vmatpush1.msra.mxu0 %v58_v6  ;;  %473 = vmatpush1.msra.mxu1 %v76_v7 }
  0x26   :  { %405 = vmatprep.subr.mxu0 %v43_v8  ;;  %474 = vmatprep.subr.mxu1 %v61_v9 }
  0x27   :  { %406 = vmatpush1.msra.mxu0 %v42_v10  ;;  %475 = vmatpush1.msra.mxu1 %v60_v11 }
  0x28   :  { %407 = vmatprep.subr.mxu0 %v27_v12  ;;  %476 = vmatprep.subr.mxu1 %v45_v13 }
  0x29   :  { %408 = vmatpush1.msra.mxu0 %v26_v14  ;;  %441 = vmatprep.mubr.f32.mxu0 %v1941_v40 }
  0x2a   :  { %477 = vmatpush1.msra.mxu1 %v44_v15  ;;  %1673 = vmatmul.mubr.msk.f32.vlgmr.msra.gmra.mxu0 %vm182_vm1, %v2097_v38 }
  0x2b   :  { %478 = vmatprep.subr.mxu1 %v29_v16  ;;  %1677 = vmatprep.subr.msk.mxu0 %vm186_vm0, %v175_v17 }
  0x2c   :  { %479 = vmatpush1.msra.mxu1 %v28_v18  ;;  %1678 = vmatpush1.msk.msra.mxu0 %vm186_vm0, %v174_v19 }
  0x2d   :  { %512 = vmatprep.mubr.f32.mxu1 %v1941_v40  ;;  %533 = vmatprep.subr.mxu0 %v159_v20 }
  0x2e   :  { %1680 = vmatprep.subr.msk.mxu1 %vm186_vm0, %v177_v21  ;;  %1676 = vmatmul.mubr.msk.f32.vlgmr.msra.gmra.mxu1 %vm182_vm1, %v2097_v38 }
  0x2f   :  { %534 = vmatpush1.msra.mxu0 %v158_v22  ;;  %1681 = vmatpush1.msk.msra.mxu1 %vm186_vm0, %v176_v23 }
  0x30   :  { %535 = vmatprep.subr.mxu0 %v143_v24  ;;  %604 = vmatprep.subr.mxu1 %v161_v25 }
  0x31   :  { %536 = vmatpush1.msra.mxu0 %v142_v26  ;;  %605 = vmatpush1.msra.mxu1 %v160_v27 }
  0x32   :  { %537 = vmatprep.subr.mxu0 %v127_v28  ;;  %606 = vmatprep.subr.mxu1 %v145_v29 }
  0x33   :  { %538 = vmatpush1.msra.mxu0 %v126_v30  ;;  %607 = vmatpush1.msra.mxu1 %v144_v31 }
  0x34   :  { %539 = vmatprep.subr.mxu0 %v111_v32  ;;  %608 = vmatprep.subr.mxu1 %v129_v33 }
  0x35   :  { %540 = vmatpush1.msra.mxu0 %v110_v34 }
  0x36   :  { %10 = vsyncpa [#allocation3], 0  ;;  %609 = vmatpush1.msra.mxu1 %v128_v35  ;;  %541 = vmatprep.subr.mxu0 %v95_v36  ;;  %v97_v43 = vld [vmem:[%s3268_s0 + $0x258] sm:$0xff]  ;;  %v78_v44 = vld [vmem:[%s3268_s0 + $0x1c0] sm:$0xff]  ;;  %vm803_vm2 = vcmask 1045504   ;;  %s1944_s12 = smov 1  }
  0x37   :  { %610 = vmatprep.subr.mxu1 %v113_v37  ;;  %542 = vmatpush1.msra.mxu0 %v94_v39  ;;  %v96_v45 = vld [vmem:[%s3268_s0 + $0x250] sm:$0xff]  ;;  %v63_v46 = vld [vmem:[%s3268_s0 + $0x148] sm:$0xff]  ;;  %v81_v47 = vld [vmem:[%s3268_s0 + $0x1d8] sm:$0xff]  ;;  %vm1017_vm3 = vcmask 1040384   ;;  %vm1649_vm4 = vcmask 74752  }
  0x38   :  { %611 = vmatpush1.msra.mxu1 %v112_v41  ;;  %543 = vmatprep.subr.mxu0 %v79_v42  ;;  %v62_v48 = vld [vmem:[%s3268_s0 + $0x140] sm:$0xff]  ;;  %v80_v49 = vld [vmem:[%s3268_s0 + $0x1d0] sm:$0xff]  ;;  %v47_v50 = vld [vmem:[%s3268_s0 + $0xc8] sm:$0xff] }
  0x39   :  { %612 = vmatprep.subr.mxu1 %v97_v43  ;;  %544 = vmatpush1.msra.mxu0 %v78_v44  ;;  %v65_v51 = vld [vmem:[%s3268_s0 + $0x158] sm:$0xff]  ;;  %v46_v52 = vld [vmem:[%s3268_s0 + $0xc0] sm:$0xff]  ;;  %v64_v53 = vld [vmem:[%s3268_s0 + $0x150] sm:$0xff] }
  0x3a   :  { %613 = vmatpush1.msra.mxu1 %v96_v45  ;;  %545 = vmatprep.subr.mxu0 %v63_v46  ;;  %v31_v54 = vld [vmem:[%s3268_s0 + $0x48] sm:$0xff]  ;;  %v49_v55 = vld [vmem:[%s3268_s0 + $0xd8] sm:$0xff]  ;;  %v30_v56 = vld [vmem:[%s3268_s0 + $0x40] sm:$0xff] }
  0x3b   :  { %614 = vmatprep.subr.mxu1 %v81_v47  ;;  %546 = vmatpush1.msra.mxu0 %v62_v48  ;;  %v48_v57 = vld [vmem:[%s3268_s0 + $0xd0] sm:$0xff]  ;;  %v33_v58 = vld [vmem:[%s3268_s0 + $0x58] sm:$0xff]  ;;  %v179_v59 = vld [vmem:[%s3268_s0 + $0x4e8] sm:$0x7] }
  0x3c   :  { %615 = vmatpush1.msra.mxu1 %v80_v49  ;;  %547 = vmatprep.subr.mxu0 %v47_v50  ;;  %v32_v60 = vld [vmem:[%s3268_s0 + $0x50] sm:$0xff]  ;;  %v178_v61 = vld [vmem:[%s3268_s0 + $0x4e0] sm:$0x7]  ;;  %v163_v62 = vld [vmem:[%s3268_s0 + $0x468] sm:$0xff] }
  0x3d   :  { %616 = vmatprep.subr.mxu1 %v65_v51  ;;  %548 = vmatpush1.msra.mxu0 %v46_v52  ;;  %v181_v63 = vld [vmem:[%s3268_s0 + $0x4f8] sm:$0x7]  ;;  %v162_v0 = vld [vmem:[%s3268_s0 + $0x460] sm:$0xff]  ;;  %v180_v1 = vld [vmem:[%s3268_s0 + $0x4f0] sm:$0x7] }
  0x3e   :  { %617 = vmatpush1.msra.mxu1 %v64_v53  ;;  %549 = vmatprep.subr.mxu0 %v31_v54  ;;  %v147_v2 = vld [vmem:[%s3268_s0 + $0x3e8] sm:$0xff]  ;;  %v165_v3 = vld [vmem:[%s3268_s0 + $0x478] sm:$0xff]  ;;  %v146_v4 = vld [vmem:[%s3268_s0 + $0x3e0] sm:$0xff] }
  0x3f   :  { %618 = vmatprep.subr.mxu1 %v49_v55  ;;  %550 = vmatpush1.msra.mxu0 %v30_v56  ;;  %v164_v5 = vld [vmem:[%s3268_s0 + $0x470] sm:$0xff]  ;;  %v131_v6 = vld [vmem:[%s3268_s0 + $0x368] sm:$0xff]  ;;  %v149_v7 = vld [vmem:[%s3268_s0 + $0x3f8] sm:$0xff] }
  0x40   :  { %583 = vmatprep.mubr.f32.mxu0 %v1941_v40  ;;  %619 = vmatpush1.msra.mxu1 %v48_v57  ;;  %v130_v8 = vld [vmem:[%s3268_s0 + $0x360] sm:$0xff]  ;;  %v148_v9 = vld [vmem:[%s3268_s0 + $0x3f0] sm:$0xff]  ;;  %v115_v10 = vld [vmem:[%s3268_s0 + $0x2e8] sm:$0xff] }
  0x41   :  { %1679 = vmatmul.mubr.msk.f32.vlgmr.msra.gmra.mxu0 %vm182_vm1, %v2097_v38  ;;  %620 = vmatprep.subr.mxu1 %v33_v58  ;;  %v133_v11 = vld [vmem:[%s3268_s0 + $0x378] sm:$0xff]  ;;  %v114_v12 = vld [vmem:[%s3268_s0 + $0x2e0] sm:$0xff]  ;;  %v132_v13 = vld [vmem:[%s3268_s0 + $0x370] sm:$0xff] }
  0x42   :  { %1683 = vmatprep.subr.msk.mxu0 %vm186_vm0, %v179_v59  ;;  %621 = vmatpush1.msra.mxu1 %v32_v60  ;;  %v99_v14 = vld [vmem:[%s3268_s0 + $0x268] sm:$0xff]  ;;  %v117_v15 = vld [vmem:[%s3268_s0 + $0x2f8] sm:$0xff]  ;;  %v98_v16 = vld [vmem:[%s3268_s0 + $0x260] sm:$0xff] }
  0x43   :  { %1684 = vmatpush1.msk.msra.mxu0 %vm186_vm0, %v178_v61  ;;  %654 = vmatprep.mubr.f32.mxu1 %v1941_v40  ;;  %v116_v17 = vld [vmem:[%s3268_s0 + $0x2f0] sm:$0xff]  ;;  %v83_v18 = vld [vmem:[%s3268_s0 + $0x1e8] sm:$0xff]  ;;  %v101_v19 = vld [vmem:[%s3268_s0 + $0x278] sm:$0xff] }
  0x44   :  { %675 = vmatprep.subr.mxu0 %v163_v62  ;;  %1686 = vmatprep.subr.msk.mxu1 %vm186_vm0, %v181_v63  ;;  %v82_v20 = vld [vmem:[%s3268_s0 + $0x1e0] sm:$0xff]  ;;  %v100_v21 = vld [vmem:[%s3268_s0 + $0x270] sm:$0xff]  ;;  %v67_v22 = vld [vmem:[%s3268_s0 + $0x168] sm:$0xff] }
  0x45   :  { %1682 = vmatmul.mubr.msk.f32.vlgmr.msra.gmra.mxu1 %vm182_vm1, %v2097_v38  ;;  %676 = vmatpush1.msra.mxu0 %v162_v0  ;;  %v85_v23 = vld [vmem:[%s3268_s0 + $0x1f8] sm:$0xff]  ;;  %v66_v24 = vld [vmem:[%s3268_s0 + $0x160] sm:$0xff]  ;;  %v84_v25 = vld [vmem:[%s3268_s0 + $0x1f0] sm:$0xff] }
  0x46   :  { %1687 = vmatpush1.msk.msra.mxu1 %vm186_vm0, %v180_v1  ;;  %677 = vmatprep.subr.mxu0 %v147_v2  ;;  %v51_v26 = vld [vmem:[%s3268_s0 + $0xe8] sm:$0xff]  ;;  %v69_v27 = vld [vmem:[%s3268_s0 + $0x178] sm:$0xff]  ;;  %v50_v28 = vld [vmem:[%s3268_s0 + $0xe0] sm:$0xff] }
  0x47   :  { %746 = vmatprep.subr.mxu1 %v165_v3  ;;  %678 = vmatpush1.msra.mxu0 %v146_v4  ;;  %v68_v29 = vld [vmem:[%s3268_s0 + $0x170] sm:$0xff]  ;;  %v35_v30 = vld [vmem:[%s3268_s0 + $0x68] sm:$0xff]  ;;  %v53_v31 = vld [vmem:[%s3268_s0 + $0xf8] sm:$0xff] }
  0x48   :  { %747 = vmatpush1.msra.mxu1 %v164_v5  ;;  %679 = vmatprep.subr.mxu0 %v131_v6  ;;  %v34_v32 = vld [vmem:[%s3268_s0 + $0x60] sm:$0xff]  ;;  %v52_v33 = vld [vmem:[%s3268_s0 + $0xf0] sm:$0xff]  ;;  %v37_v34 = vld [vmem:[%s3268_s0 + $0x78] sm:$0xff] }
  0x49   :  { %748 = vmatprep.subr.mxu1 %v149_v7  ;;  %680 = vmatpush1.msra.mxu0 %v130_v8  ;;  %v36_v35 = vld [vmem:[%s3268_s0 + $0x70] sm:$0xff] }
  0x4a   :  { %749 = vmatpush1.msra.mxu1 %v148_v9  ;;  %681 = vmatprep.subr.mxu0 %v115_v10 }
  0x4b   :  { %750 = vmatprep.subr.mxu1 %v133_v11  ;;  %682 = vmatpush1.msra.mxu0 %v114_v12 }
  0x4c   :  { %751 = vmatpush1.msra.mxu1 %v132_v13  ;;  %683 = vmatprep.subr.mxu0 %v99_v14 }
  0x4d   :  { %752 = vmatprep.subr.mxu1 %v117_v15  ;;  %684 = vmatpush1.msra.mxu0 %v98_v16 }
  0x4e   :  { %753 = vmatpush1.msra.mxu1 %v116_v17  ;;  %685 = vmatprep.subr.mxu0 %v83_v18 }
  0x4f   :  { %754 = vmatprep.subr.mxu1 %v101_v19  ;;  %686 = vmatpush1.msra.mxu0 %v82_v20 }
  0x50   :  { %755 = vmatpush1.msra.mxu1 %v100_v21  ;;  %687 = vmatprep.subr.mxu0 %v67_v22 }
  0x51   :  { %756 = vmatprep.subr.mxu1 %v85_v23  ;;  %688 = vmatpush1.msra.mxu0 %v66_v24 }
  0x52   :  { %757 = vmatpush1.msra.mxu1 %v84_v25  ;;  %689 = vmatprep.subr.mxu0 %v51_v26 }
  0x53   :  { %758 = vmatprep.subr.mxu1 %v69_v27  ;;  %690 = vmatpush1.msra.mxu0 %v50_v28 }
  0x54   :  { %759 = vmatpush1.msra.mxu1 %v68_v29  ;;  %691 = vmatprep.subr.mxu0 %v35_v30 }
  0x55   :  { %760 = vmatprep.subr.mxu1 %v53_v31  ;;  %692 = vmatpush1.msra.mxu0 %v34_v32 }
  0x56   :  { %725 = vmatprep.mubr.f32.mxu0 %v1941_v40  ;;  %761 = vmatpush1.msra.mxu1 %v52_v33 }
  0x57   :  { %1685 = vmatmul.mubr.msk.f32.vlgmr.msra.gmra.mxu0 %vm182_vm1, %v2097_v38  ;;  %762 = vmatprep.subr.mxu1 %v37_v34 }
  0x58   :  { %763 = vmatpush1.msra.mxu1 %v36_v35  ;;  %796 = vmatprep.mubr.f32.mxu1 %v1941_v40 }
  0x59   :  { %1688 = vmatmul.mubr.msk.f32.vlgmr.msra.gmra.mxu1 %vm182_vm1, %v2097_v38 }
  0xd6   :  { %v2501_v36 = vpop.f32.mrf.mxu0 }
  0xd7   :  { %v837_v39 = vmul.f32 %v2501_v36, %v2501_v36  ;;  %v804_v43 = vsel %vm803_vm2, %v2501_v36, 0.0 }
  0xd8   :  { %v2503_v37 = vpop.f32.mrf.mxu0  ;;  %v2509_v42 = vpop.f32.mrf.mxu1 }
  0xd9   :  { %v838_v41 = vmul.f32 %v2503_v37, %v2503_v37  ;;  %v805_v40 = vsel %vm803_vm2, %v2503_v37, 0.0  ;;  %v853_v38 = vsel %vm803_vm2, %v837_v39, 0.0  ;;  %v839_v45 = vmul.f32 %v2509_v42, %v2509_v42 }
  0xda   :  { %v806_v46 = vadd.f32 %v805_v40, %v804_v43  ;;  %v2519_v47 = vpop.f32.mrf.mxu1  ;;  %v807_v48 = vsel %vm803_vm2, %v2509_v42, 0.0 }
  0xdb   :  { %v854_v44 = vsel %vm803_vm2, %v838_v41, 0.0  ;;  %v856_v51 = vsel %vm803_vm2, %v839_v45, 0.0  ;;  %v840_v52 = vmul.f32 %v2519_v47, %v2519_v47  ;;  %v809_v54 = vsel %vm803_vm2, %v2519_v47, 0.0 }
  0xdc   :  { %v855_v49 = vadd.f32 %v854_v44, %v853_v38  ;;  %v808_v53 = vadd.f32 %v807_v48, %v806_v46 }
  0xdd   :  { %v858_v58 = vsel %vm803_vm2, %v840_v52, 0.0 }
  0xde   :  { %v857_v56 = vadd.f32 %v856_v51, %v855_v49  ;;  %v810_v60 = vadd.f32 %v809_v54, %v808_v53 }
  0xe0   :  { %v859_v63 = vadd.f32 %v858_v58, %v857_v56 }
  0xea   :  { %v2523_v50 = vpop.f32.mrf.mxu0 }
  0xeb   :  { %v841_v55 = vmul.f32 %v2523_v50, %v2523_v50  ;;  %v811_v59 = vsel %vm803_vm2, %v2523_v50, 0.0 }
  0xec   :  { %v2532_v57 = vpop.f32.mrf.mxu0  ;;  %v812_v0 = vadd.f32 %v811_v59, %v810_v60 }
  0xed   :  { %v860_v61 = vsel %vm803_vm2, %v841_v55, 0.0  ;;  %v842_v62 = vmul.f32 %v2532_v57, %v2532_v57  ;;  %v813_v2 = vsel %vm803_vm2, %v2532_v57, 0.0 }
  0xee   :  { %v2540_v1 = vpop.f32.mrf.mxu1  ;;  %v861_v3 = vadd.f32 %v860_v61, %v859_v63  ;;  %v814_v6 = vadd.f32 %v813_v2, %v812_v0 }
  0xef   :  { %v862_v4 = vsel %vm803_vm2, %v842_v62, 0.0  ;;  %v843_v5 = vmul.f32 %v2540_v1, %v2540_v1  ;;  %v815_v8 = vsel %vm803_vm2, %v2540_v1, 0.0 }
  0xf0   :  { %v2547_v7 = vpop.f32.mrf.mxu1  ;;  %v863_v9 = vadd.f32 %v862_v4, %v861_v3  ;;  %v816_v13 = vadd.f32 %v815_v8, %v814_v6 }
  0xf1   :  { %v864_v11 = vsel %vm803_vm2, %v843_v5, 0.0  ;;  %v844_v12 = vmul.f32 %v2547_v7, %v2547_v7  ;;  %v817_v14 = vsel %vm803_vm2, %v2547_v7, 0.0 }
  0xf2   :  { %v865_v16 = vadd.f32 %v864_v11, %v863_v9  ;;  %v818_v20 = vadd.f32 %v817_v14, %v816_v13  ;;  %v1942_v11 = vmov 0  }
  0xf3   :  { %v866_v18 = vsel %vm803_vm2, %v844_v12, 0.0  ;;  %1915 = vset.pattern.permute.xlu1 %v1942_v11  ;;  %v1069_v11 = vld [vmem:[%s3271_s3 + $0x138] sm:$0xff] }
  0xf4   :  { %v867_v23 = vadd.f32 %v866_v18, %v865_v16 }
 0x101   :  { %v2551_v10 = vpop.f32.mrf.mxu0 }
 0x102   :  { %v845_v15 = vmul.f32 %v2551_v10, %v2551_v10  ;;  %v819_v19 = vsel %vm803_vm2, %v2551_v10, 0.0 }
 0x103   :  { %v2560_v17 = vpop.f32.mrf.mxu0  ;;  %v820_v24 = vadd.f32 %v819_v19, %v818_v20  ;;  %v1943_v20 = vmov 1  }
 0x104   :  { %v868_v21 = vsel %vm803_vm2, %v845_v15, 0.0  ;;  %v846_v22 = vmul.f32 %v2560_v17, %v2560_v17  ;;  %v821_v26 = vsel %vm803_vm2, %v2560_v17, 0.0  ;;  %1916 = vset.pattern.permute.xlu0 %v1943_v20  ;;  %v1067_v20 = vld [vmem:[%s3271_s3 + $0x128] sm:$0xff] }
 0x105   :  { %v2568_v25 = vpop.f32.mrf.mxu1  ;;  %v869_v27 = vadd.f32 %v868_v21, %v867_v23  ;;  %v822_v30 = vadd.f32 %v821_v26, %v820_v24  ;;  %v2616_v21 = vld [vmem:[%s3270_s2] sm:$0x3f]  ;;  %v1061_v26 = vld [vmem:[%s3271_s3 + $0xf8] sm:$0xff] }
 0x106   :  { %v870_v28 = vsel %vm803_vm2, %v846_v22, 0.0  ;;  %v847_v29 = vmul.f32 %v2568_v25, %v2568_v25  ;;  %v823_v32 = vsel %vm803_vm2, %v2568_v25, 0.0  ;;  %1700 = vmatprep.subr.mxu0 %v1061_v26  ;;  %v1066_v26 = vld [vmem:[%s3271_s3 + $0x120] sm:$0xff] }
 0x107   :  { %v2575_v31 = vpop.f32.mrf.mxu1  ;;  %v871_v33 = vadd.f32 %v870_v28, %v869_v27  ;;  %v824_v39 = vadd.f32 %v823_v32, %v822_v30  ;;  %v1093_v27 = vld [vmem:[%s3271_s3 + $0x1f8] sm:$0xff]  ;;  %v1060_v30 = vld [vmem:[%s3271_s3 + $0xf0] sm:$0xff] }
 0x108   :  { %v872_v34 = vsel %vm803_vm2, %v847_v29, 0.0  ;;  %v848_v35 = vmul.f32 %v2575_v31, %v2575_v31  ;;  %v825_v41 = vsel %vm803_vm2, %v2575_v31, 0.0  ;;  %v1045_v28 = vld [vmem:[%s3271_s3 + $0x78] sm:$0xff]  ;;  %v1092_v32 = vld [vmem:[%s3271_s3 + $0x1f0] sm:$0xff]  ;;  %1735 = vmatprep.subr.mxu1 %v1093_v27 }
 0x109   :  { %v873_v43 = vadd.f32 %v872_v34, %v871_v33  ;;  %v826_v38 = vadd.f32 %v825_v41, %v824_v39  ;;  %v1077_v29 = vld [vmem:[%s3271_s3 + $0x178] sm:$0xff]  ;;  %1701 = vmatpush3.msra.mxu0 %v1045_v28  ;;  %v1044_v33 = vld [vmem:[%s3271_s3 + $0x70] sm:$0xff]  ;;  %v1091_v39 = vld [vmem:[%s3271_s3 + $0x1e8] sm:$0xff] }
 0x10a   :  { %v874_v40 = vsel %vm803_vm2, %v848_v35, 0.0  ;;  %v1076_v34 = vld [vmem:[%s3271_s3 + $0x170] sm:$0xff]  ;;  %1736 = vmatpush3.msra.mxu1 %v1077_v29  ;;  %1702 = vmatprep.subr.mxu0 %v1060_v30  ;;  %v1059_v35 = vld [vmem:[%s3271_s3 + $0xe8] sm:$0xff]  ;;  %v1049_v28 = vld [vmem:[%s3271_s3 + $0x98] sm:$0xff] }
 0x10b   :  { %v875_v48 = vadd.f32 %v874_v40, %v873_v43  ;;  %1737 = vmatprep.subr.mxu1 %v1092_v32  ;;  %1703 = vmatpush3.msra.mxu0 %v1044_v33  ;;  %v1043_v41 = vld [vmem:[%s3271_s3 + $0x68] sm:$0xff]  ;;  %v1058_v40 = vld [vmem:[%s3271_s3 + $0xe0] sm:$0xff]  ;;  %v1081_v29 = vld [vmem:[%s3271_s3 + $0x198] sm:$0xff] }
 0x10c   :  { %v1075_v43 = vld [vmem:[%s3271_s3 + $0x168] sm:$0xff]  ;;  %1738 = vmatpush3.msra.mxu1 %v1076_v34  ;;  %1704 = vmatprep.subr.mxu0 %v1059_v35  ;;  %v1033_v30 = vld [vmem:[%s3271_s3 + $0x18] sm:$0xff]  ;;  %v1048_v34 = vld [vmem:[%s3271_s3 + $0x90] sm:$0xff] }
 0x10d   :  { %1739 = vmatprep.subr.mxu1 %v1091_v39  ;;  %1705 = vmatpush3.msra.mxu0 %v1043_v41  ;;  %v1065_v33 = vld [vmem:[%s3271_s3 + $0x118] sm:$0xff]  ;;  %v1080_v35 = vld [vmem:[%s3271_s3 + $0x190] sm:$0xff]  ;;  %v1047_v41 = vld [vmem:[%s3271_s3 + $0x88] sm:$0xff] }
 0x10e   :  { %1740 = vmatpush3.msra.mxu1 %v1075_v43  ;;  %1706 = vmatprep.subr.mxu0 %v1058_v40  ;;  %v1064_v39 = vld [vmem:[%s3271_s3 + $0x110] sm:$0xff]  ;;  %v1079_v43 = vld [vmem:[%s3271_s3 + $0x188] sm:$0xff] }
 0x10f   :  { %v1031_v40 = vld [vmem:[%s3271_s3 + $0x8] sm:$0xff] }
 0x117   :  { %v2585_v44 = vpop.f32.mrf.mxu0 }
 0x118   :  { %v827_v45 = vsel %vm803_vm2, %v2585_v44, 0.0  ;;  %v849_v46 = vmul.f32 %v2585_v44, %v2585_v44 }
 0x119   :  { %v828_v49 = vadd.f32 %v827_v45, %v826_v38  ;;  %v2591_v51 = vpop.f32.mrf.mxu0  ;;  %v2593_v52 = vpop.f32.mrf.mxu1  ;;  %v1090_v38 = vld [vmem:[%s3271_s3 + $0x1e0] sm:$0xff] }
 0x11a   :  { %v876_v53 = vsel %vm803_vm2, %v849_v46, 0.0  ;;  %v829_v54 = vsel %vm803_vm2, %v2591_v51, 0.0  ;;  %v850_v55 = vmul.f32 %v2591_v51, %v2591_v51  ;;  %v851_v56 = vmul.f32 %v2593_v52, %v2593_v52  ;;  %v1042_v45 = vld [vmem:[%s3271_s3 + $0x60] sm:$0xff]  ;;  %1741 = vmatprep.subr.mxu1 %v1090_v38  ;;  %v1063_v38 = vld [vmem:[%s3271_s3 + $0x108] sm:$0xff] }
 0x11b   :  { %v877_v58 = vadd.f32 %v876_v53, %v875_v48  ;;  %v2602_v59 = vpop.f32.mrf.mxu1  ;;  %v830_v60 = vadd.f32 %v829_v54, %v828_v49  ;;  %v831_v61 = vsel %vm803_vm2, %v2593_v52, 0.0  ;;  %v1074_v46 = vld [vmem:[%s3271_s3 + $0x160] sm:$0xff]  ;;  %v1057_v48 = vld [vmem:[%s3271_s3 + $0xd8] sm:$0xff]  ;;  %1707 = vmatpush3.msra.mxu0 %v1042_v45 }
 0x11c   :  { %v878_v62 = vsel %vm803_vm2, %v850_v55, 0.0  ;;  %v880_v63 = vsel %vm803_vm2, %v851_v56, 0.0  ;;  %v852_v3 = vmul.f32 %v2602_v59, %v2602_v59  ;;  %v833_v4 = vsel %vm803_vm2, %v2602_v59, 0.0  ;;  %v1089_v49 = vld [vmem:[%s3271_s3 + $0x1d8] sm:$0xff]  ;;  %1742 = vmatpush3.msra.mxu1 %v1074_v46  ;;  %v1056_v55 = vld [vmem:[%s3271_s3 + $0xd0] sm:$0xff]  ;;  %1708 = vmatprep.subr.mxu0 %v1057_v48  ;;  %v1046_v45 = vld [vmem:[%s3271_s3 + $0x80] sm:$0xff] }
 0x11d   :  { %v832_v0 = vadd.f32 %v831_v61, %v830_v60  ;;  %v879_v2 = vadd.f32 %v878_v62, %v877_v58  ;;  %v1041_v53 = vld [vmem:[%s3271_s3 + $0x58] sm:$0xff]  ;;  %v1088_v56 = vld [vmem:[%s3271_s3 + $0x1d0] sm:$0xff]  ;;  %1743 = vmatprep.subr.mxu1 %v1089_v49  ;;  %v1055_v61 = vld [vmem:[%s3271_s3 + $0xc8] sm:$0xff] }
 0x11e   :  { %v882_v8 = vsel %vm803_vm2, %v852_v3, 0.0  ;;  %v1073_v54 = vld [vmem:[%s3271_s3 + $0x158] sm:$0xff]  ;;  %v1040_v58 = vld [vmem:[%s3271_s3 + $0x50] sm:$0xff]  ;;  %1709 = vmatpush3.msra.mxu0 %v1041_v53  ;;  %v1087_v62 = vld [vmem:[%s3271_s3 + $0x1c8] sm:$0xff] }
 0x11f   :  { %v834_v5 = vadd.f32 %v833_v4, %v832_v0  ;;  %v881_v6 = vadd.f32 %v880_v63, %v879_v2  ;;  %v1072_v60 = vld [vmem:[%s3271_s3 + $0x150] sm:$0xff]  ;;  %1744 = vmatpush3.msra.mxu1 %v1073_v54  ;;  %1710 = vmatprep.subr.mxu0 %v1056_v55  ;;  %v1039_v63 = vld [vmem:[%s3271_s3 + $0x48] sm:$0xff]  ;;  %v1054_v2 = vld [vmem:[%s3271_s3 + $0xc0] sm:$0xff] }
 0x120   :  { %1745 = vmatprep.subr.mxu1 %v1088_v56  ;;  %v1071_v0 = vld [vmem:[%s3271_s3 + $0x148] sm:$0xff]  ;;  %1711 = vmatpush3.msra.mxu0 %v1040_v58  ;;  %v1086_v3 = vld [vmem:[%s3271_s3 + $0x1c0] sm:$0xff]  ;;  %v1125_v53 = vld [vmem:[%s3271_s3 + $0x2f8] sm:$0xff] }
 0x121   :  { %835 = vadd.xlane.f32.xlu0 %v834_v5  ;;  %v883_v9 = vadd.f32 %v882_v8, %v881_v6  ;;  %1746 = vmatpush3.msra.mxu1 %v1072_v60  ;;  %v1038_v4 = vld [vmem:[%s3271_s3 + $0x40] sm:$0xff]  ;;  %v1053_v6 = vld [vmem:[%s3271_s3 + $0xb8] sm:$0xff] }
 0x122   :  { %1712 = vmatprep.subr.mxu0 %v1055_v61  ;;  %1747 = vmatprep.subr.mxu1 %v1087_v62  ;;  %v1070_v5 = vld [vmem:[%s3271_s3 + $0x140] sm:$0xff]  ;;  %v1085_v8 = vld [vmem:[%s3271_s3 + $0x1b8] sm:$0xff] }
 0x123   :  { %1713 = vmatpush3.msra.mxu0 %v1039_v63  ;;  %1748 = vmatpush3.msra.mxu1 %v1071_v0  ;;  %v1078_v46 = vld [vmem:[%s3271_s3 + $0x180] sm:$0xff]  ;;  %v1157_v54 = vld [vmem:[%s3271_s3 + $0x3f8] sm:$0xff] }
 0x124   :  { %1714 = vmatprep.subr.mxu0 %v1054_v2  ;;  %1749 = vmatprep.subr.mxu1 %v1086_v3  ;;  %v1030_v48 = vld [vmem:[%s3271_s3] sm:$0xff] }
 0x125   :  { %884 = vadd.xlane.f32.xlu0 %v883_v9  ;;  %v1037_v9 = vld [vmem:[%s3271_s3 + $0x38] sm:$0xff]  ;;  %1715 = vmatpush3.msra.mxu0 %v1038_v4  ;;  %v1062_v49 = vld [vmem:[%s3271_s3 + $0x100] sm:$0xff] }
 0x126   :  { %1750 = vmatpush3.msra.mxu1 %v1070_v5  ;;  %1716 = vmatprep.subr.mxu0 %v1053_v6 }
 0x127   :  { %1751 = vmatprep.subr.mxu1 %v1085_v8  ;;  %1717 = vmatpush3.msra.mxu0 %v1037_v9 }
 0x128   :  { %1752 = vmatpush3.msra.mxu1 %v1069_v11 }
 0x1aa   :  { %v836_v12 = vpop.xlane.xlu0 %835 }
 0x1ab   :  { %v887_v13 = vmul.f32 0.0006377551, %v836_v12  ;;  %v1052_v12 = vld [vmem:[%s3271_s3 + $0xb0] sm:$0xff] }
 0x1ac   :  { %1718 = vmatprep.subr.mxu0 %v1052_v12 }
 0x1ad   :  { %v889_v15 = vmul.f32 %v887_v13, %v887_v13 }
 0x1ae   :  { %v885_v14 = vpop.xlane.xlu0 %884 }
 0x1af   :  { %v888_v16 = vmul.f32 0.0006377551, %v885_v14  ;;  %v1036_v14 = vld [vmem:[%s3271_s3 + $0x30] sm:$0xff] }
 0x1b0   :  { %1719 = vmatpush3.msra.mxu0 %v1036_v14 }
 0x1b1   :  { %v890_v18 = vsub.f32 %v888_v16, %v889_v15  ;;  %v1068_v15 = vld [vmem:[%s3271_s3 + $0x130] sm:$0xff]  ;;  %v1051_v16 = vld [vmem:[%s3271_s3 + $0xa8] sm:$0xff] }
 0x1b2   :  { %1720 = vmatprep.subr.mxu0 %v1051_v16 }
 0x1b3   :  { %v892_v19 = vadd.f32 1e-05, %v890_v18  ;;  %v1083_v18 = vld [vmem:[%s3271_s3 + $0x1a8] sm:$0xff] }
 0x1b5   :  { %1917 = vrsqrt.f32 %v892_v19  ;;  %v1035_v19 = vld [vmem:[%s3271_s3 + $0x28] sm:$0xff] }
 0x1b6   :  { %1721 = vmatpush3.msra.mxu0 %v1035_v19 }
 0x1c2   :  { %v1918_v22 = vpop.eup %1917 }
 0x1c3   :  { %v894_v23 = vmul.f32 %v1918_v22, %v2616_v21  ;;  %v1050_v22 = vld [vmem:[%s3271_s3 + $0xa0] sm:$0xff] }
 0x1c4   :  { %1722 = vmatprep.subr.mxu0 %v1050_v22 }
 0x1c5   :  { %v895_v24 = vmul.f32 %v894_v23, %v887_v13  ;;  %v1084_v13 = vld [vmem:[%s3271_s3 + $0x1b0] sm:$0xff] }
 0x1c6   :  { %1753 = vmatprep.subr.mxu1 %v1084_v13 }
 0x1c7   :  { %897 = vrot.lane.b32.xlu1 %v895_v24, %s1944_s12  ;;  %1754 = vmatpush3.msra.mxu1 %v1068_v15  ;;  %v1034_v24 = vld [vmem:[%s3271_s3 + $0x20] sm:$0xff] }
 0x1c8   :  { %1755 = vmatprep.subr.mxu1 %v1083_v18  ;;  %1723 = vmatpush3.msra.mxu0 %v1034_v24 }
 0x1c9   :  { %1756 = vmatpush3.msra.mxu1 %v1067_v20  ;;  %1724 = vmatprep.subr.mxu0 %v1049_v28 }
 0x1ca   :  { %1725 = vmatpush3.msra.mxu0 %v1033_v30 }
 0x1cb   :  { %903 = vperm.xlu1 %1915, %v894_v23   ;;  %v1082_v23 = vld [vmem:[%s3271_s3 + $0x1a0] sm:$0xff]  ;;  %1726 = vmatprep.subr.mxu0 %v1048_v34 }
 0x1cc   :  { %1757 = vmatprep.subr.mxu1 %v1082_v23 }
 0x1cd   :  { %1758 = vmatpush3.msra.mxu1 %v1066_v26 }
 0x1ce   :  { %1759 = vmatprep.subr.mxu1 %v1081_v29 }
 0x1cf   :  { %1760 = vmatpush3.msra.mxu1 %v1065_v33 }
 0x1d0   :  { %1761 = vmatprep.subr.mxu1 %v1080_v35 }
 0x1d1   :  { %1762 = vmatpush3.msra.mxu1 %v1064_v39 }
 0x1d2   :  { %1763 = vmatprep.subr.mxu1 %v1079_v43 }
 0x1d3   :  { %1764 = vmatpush3.msra.mxu1 %v1063_v38 }
 0x1d4   :  { %1765 = vmatprep.subr.mxu1 %v1078_v46  ;;  %v1141_v46 = vld [vmem:[%s3271_s3 + $0x378] sm:$0xff] }
 0x1d5   :  { %1766 = vmatpush3.msra.mxu1 %v1062_v49 }
 0x1d6   :  { %1805 = vmatprep.subr.mxu1 %v1157_v54 }
 0x239   :  { %v898_v27 = vpop.permute.xlu1 %897 }
 0x23a   :  { %v900_v32 = vsub.f32 %v2616_v21, %v898_v27  ;;  %v1032_v21 = vld [vmem:[%s3271_s3 + $0x10] sm:$0xff] }
 0x23b   :  { %1727 = vmatpush3.msra.mxu0 %v1032_v21 }
 0x23c   :  { %912 = vperm.xlu0 %1916, %v900_v32   ;;  %1728 = vmatprep.subr.mxu0 %v1047_v41 }
 0x23d   :  { %1729 = vmatpush3.msra.mxu0 %v1031_v40 }
 0x23e   :  { %1730 = vmatprep.subr.mxu0 %v1046_v45  ;;  %v1109_v45 = vld [vmem:[%s3271_s3 + $0x278] sm:$0xff] }
 0x23f   :  { %1731 = vmatpush3.msra.mxu0 %v1030_v48 }
 0x240   :  { %1770 = vmatprep.subr.mxu0 %v1125_v53 }
 0x246   :  { %v904_v55 = vpop.permute.xlu1 %903 }
 0x247   :  { %v907_v56 = vmul.f32 %v904_v55, %v2503_v37  ;;  %v909_v58 = vmul.f32 %v904_v55, %v2519_v47  ;;  %v920_v60 = vmul.f32 %v904_v55, %v2532_v57  ;;  %v922_v61 = vmul.f32 %v904_v55, %v2547_v7 }
 0x248   :  { %v932_v62 = vmul.f32 %v904_v55, %v2560_v17  ;;  %v934_v63 = vmul.f32 %v904_v55, %v2575_v31  ;;  %v940_v0 = vmul.f32 %v904_v55, %v2591_v51  ;;  %v942_v2 = vmul.f32 %v904_v55, %v2602_v59 }
 0x249   :  { %v906_v3 = vmul.f32 %v904_v55, %v2501_v36  ;;  %v908_v4 = vmul.f32 %v904_v55, %v2509_v42  ;;  %v919_v37 = vmul.f32 %v904_v55, %v2523_v50  ;;  %v921_v47 = vmul.f32 %v904_v55, %v2540_v1 }
 0x24a   :  { %v931_v57 = vmul.f32 %v904_v55, %v2551_v10  ;;  %v933_v7 = vmul.f32 %v904_v55, %v2568_v25  ;;  %v939_v17 = vmul.f32 %v904_v55, %v2585_v44  ;;  %v941_v31 = vmul.f32 %v904_v55, %v2593_v52  ;;  %v1124_v55 = vld [vmem:[%s3271_s3 + $0x2f0] sm:$0xff] }
 0x2b7   :  { %v913_v5 = vpop.permute.xlu0 %912 }
 0x2b8   :  { %v916_v51 = vadd.f32 %v913_v5, %v907_v56  ;;  %v918_v6 = vadd.f32 %v913_v5, %v909_v58  ;;  %v924_v59 = vadd.f32 %v920_v60, %v913_v5  ;;  %v926_v8 = vadd.f32 %v922_v61, %v913_v5  ;;  %v1156_v56 = vld [vmem:[%s3271_s3 + $0x3f0] sm:$0xff] }
 0x2b9   :  { %v936_v36 = vadd.f32 %v932_v62, %v913_v5  ;;  %v938_v9 = vadd.f32 %v934_v63, %v913_v5  ;;  %v944_v42 = vadd.f32 %v940_v0, %v913_v5  ;;  %v946_v11 = vadd.f32 %v942_v2, %v913_v5  ;;  %v1108_v61 = vld [vmem:[%s3271_s3 + $0x270] sm:$0xff] }
 0x2ba   :  { %v928_v50 = vmax.f32 %v916_v51, %v924_v59  ;;  %v930_v12 = vmax.f32 %v918_v6, %v926_v8  ;;  %v915_v1 = vadd.f32 %v913_v5, %v906_v3  ;;  %v917_v13 = vadd.f32 %v913_v5, %v908_v4  ;;  %v1140_v62 = vld [vmem:[%s3271_s3 + $0x370] sm:$0xff]  ;;  %v1123_v4 = vld [vmem:[%s3271_s3 + $0x2e8] sm:$0xff]  ;;  %v1106_v51 = vld [vmem:[%s3271_s3 + $0x260] sm:$0xff] }
 0x2bb   :  { %v948_v14 = vmax.f32 %v936_v36, %v944_v42  ;;  %v950_v10 = vmax.f32 %v938_v9, %v946_v11  ;;  %v923_v15 = vadd.f32 %v919_v37, %v913_v5  ;;  %v925_v25 = vadd.f32 %v921_v47, %v913_v5  ;;  %v1155_v37 = vld [vmem:[%s3271_s3 + $0x3e8] sm:$0xff]  ;;  %v1138_v6 = vld [vmem:[%s3271_s3 + $0x360] sm:$0xff]  ;;  %v1121_v59 = vld [vmem:[%s3271_s3 + $0x2d8] sm:$0xff] }
 0x2bc   :  { %v935_v16 = vadd.f32 %v931_v57, %v913_v5  ;;  %v937_v44 = vadd.f32 %v933_v7, %v913_v5  ;;  %v943_v18 = vadd.f32 %v939_v17, %v913_v5  ;;  %v945_v52 = vadd.f32 %v941_v31, %v913_v5  ;;  %v1107_v47 = vld [vmem:[%s3271_s3 + $0x268] sm:$0xff]  ;;  %v1122_v17 = vld [vmem:[%s3271_s3 + $0x2e0] sm:$0xff]  ;;  %v1153_v8 = vld [vmem:[%s3271_s3 + $0x3d8] sm:$0xff] }
 0x2bd   :  { %v952_v19 = vmax.f32 %v928_v50, %v948_v14  ;;  %v954_v20 = vmax.f32 %v930_v12, %v950_v10  ;;  %v927_v22 = vmax.f32 %v915_v1, %v923_v15  ;;  %v929_v23 = vmax.f32 %v917_v13, %v925_v25  ;;  %v1139_v5 = vld [vmem:[%s3271_s3 + $0x368] sm:$0xff]  ;;  %v1154_v31 = vld [vmem:[%s3271_s3 + $0x3e0] sm:$0xff]  ;;  %v1105_v36 = vld [vmem:[%s3271_s3 + $0x258] sm:$0xff] }
 0x2be   :  { %v947_v24 = vmax.f32 %v935_v16, %v943_v18  ;;  %v949_v26 = vmax.f32 %v937_v44, %v945_v52  ;;  %v1137_v9 = vld [vmem:[%s3271_s3 + $0x358] sm:$0xff]  ;;  %v1120_v42 = vld [vmem:[%s3271_s3 + $0x2d0] sm:$0xff]  ;;  %v1119_v1 = vld [vmem:[%s3271_s3 + $0x2c8] sm:$0xff] }
 0x2bf   :  { %v2834_v27 = vmax.f32 %v952_v19, 0.0  ;;  %v2836_v28 = vmax.f32 %v954_v20, 0.0  ;;  %v1152_v11 = vld [vmem:[%s3271_s3 + $0x3d0] sm:$0xff]  ;;  %v1151_v13 = vld [vmem:[%s3271_s3 + $0x3c8] sm:$0xff]  ;;  %v1118_v15 = vld [vmem:[%s3271_s3 + $0x2c0] sm:$0xff] }
 0x2c0   :  { %v951_v29 = vmax.f32 %v927_v22, %v947_v24  ;;  %v953_v30 = vmax.f32 %v929_v23, %v949_v26  ;;  %v1104_v50 = vld [vmem:[%s3271_s3 + $0x250] sm:$0xff]  ;;  %v1103_v14 = vld [vmem:[%s3271_s3 + $0x248] sm:$0xff]  ;;  %v1150_v25 = vld [vmem:[%s3271_s3 + $0x3c0] sm:$0xff] }
 0x2c1   :  { %v994_v32 = vrot.slane %v2836_v28, 7  ;;  %v962_v33 = vrot.slane %v2834_v27, 1  ;;  %v966_v40 = vrot.slane %v2834_v27, 2  ;;  %v1692_v38 = vrot.slane %v2836_v28, 9  ;;  %v1136_v12 = vld [vmem:[%s3271_s3 + $0x350] sm:$0xff]  ;;  %v1135_v10 = vld [vmem:[%s3271_s3 + $0x348] sm:$0xff] }
 0x2c2   :  { %v2840_v34 = vmax.f32 %v951_v29, 0.0  ;;  %v2842_v35 = vmax.f32 %v953_v30, 0.0  ;;  %v970_v48 = vrot.slane %v2834_v27, 3  ;;  %v1694_v49 = vrot.slane %v2836_v28, 10  ;;  %v1102_v16 = vld [vmem:[%s3271_s3 + $0x240] sm:$0xff]  ;;  %v1117_v18 = vld [vmem:[%s3271_s3 + $0x2b8] sm:$0xff] }
 0x2c3   :  { %v1019_v21 = vsel %vm1017_vm3, %v2834_v27, %v994_v32  ;;  %v1021_v39 = vsel %vm1017_vm3, %v962_v33, %v2836_v28  ;;  %v1023_v60 = vsel %vm1017_vm3, %v966_v40, %v1692_v38  ;;  %v1134_v44 = vld [vmem:[%s3271_s3 + $0x340] sm:$0xff]  ;;  %v1149_v52 = vld [vmem:[%s3271_s3 + $0x3b8] sm:$0xff]  ;;  %v1116_v22 = vld [vmem:[%s3271_s3 + $0x2b0] sm:$0xff] }
 0x2c4   :  { %1293 = vmatprep.mubr.f32.mxu0 %v1019_v21  ;;  %1363 = vmatprep.mubr.f32.mxu1 %v1021_v39  ;;  %v993_v41 = vrot.slane %v2842_v35, 7  ;;  %v961_v43 = vrot.slane %v2840_v34, 1  ;;  %v973_v58 = vrot.slane %v2840_v34, 4  ;;  %v1695_v63 = vrot.slane %v2842_v35, 11  ;;  %v1101_v19 = vld [vmem:[%s3271_s3 + $0x238] sm:$0xff]  ;;  %v1148_v23 = vld [vmem:[%s3271_s3 + $0x3b0] sm:$0xff] }
 0x2c5   :  { %v977_v0 = vrot.slane %v2840_v34, 5  ;;  %v1697_v2 = vrot.slane %v2842_v35, 12  ;;  %v1025_v3 = vsel %vm1017_vm3, %v970_v48, %v1694_v49  ;;  %v1133_v20 = vld [vmem:[%s3271_s3 + $0x338] sm:$0xff]  ;;  %v1100_v24 = vld [vmem:[%s3271_s3 + $0x230] sm:$0xff]  ;;  %v1115_v29 = vld [vmem:[%s3271_s3 + $0x2a8] sm:$0xff] }
 0x2c6   :  { %v1018_v53 = vsel %vm1017_vm3, %v2840_v34, %v993_v41  ;;  %v1020_v54 = vsel %vm1017_vm3, %v961_v43, %v2842_v35  ;;  %v2895_v57 = vsel %vm1017_vm3, %v973_v58, %v1695_v63  ;;  %v1132_v26 = vld [vmem:[%s3271_s3 + $0x330] sm:$0xff]  ;;  %v1147_v30 = vld [vmem:[%s3271_s3 + $0x3a8] sm:$0xff]  ;;  %v1114_v21 = vld [vmem:[%s3271_s3 + $0x2a0] sm:$0xff]  ;;  %v965_v63 = vrot.slane %v2840_v34, 2 }
 0x2c7   :  { %1294 = vmatmul.mubr.f32.vlgmr.msra.gmra.mxu0 %v1018_v53  ;;  %1364 = vmatmul.mubr.f32.vlgmr.msra.gmra.mxu1 %v1020_v54  ;;  %v2898_v7 = vsel %vm1017_vm3, %v977_v0, %v1697_v2  ;;  %v1099_v32 = vld [vmem:[%s3271_s3 + $0x228] sm:$0xff]  ;;  %v1146_v39 = vld [vmem:[%s3271_s3 + $0x3a0] sm:$0xff]  ;;  %v1113_v40 = vld [vmem:[%s3271_s3 + $0x298] sm:$0xff]  ;;  %v1691_v0 = vrot.slane %v2842_v35, 9  ;;  %v969_v2 = vrot.slane %v2840_v34, 3 }
 0x2c8   :  { %1771 = vmatpush3.msra.mxu0 %v1109_v45  ;;  %1806 = vmatpush3.msra.mxu1 %v1141_v46  ;;  %v1131_v33 = vld [vmem:[%s3271_s3 + $0x328] sm:$0xff]  ;;  %v1098_v41 = vld [vmem:[%s3271_s3 + $0x220] sm:$0xff]  ;;  %v1145_v38 = vld [vmem:[%s3271_s3 + $0x398] sm:$0xff] }
 0x2c9   :  { %1772 = vmatprep.subr.mxu0 %v1124_v55  ;;  %1433 = vmatprep.mubr.f32.mxu0 %v1023_v60  ;;  %v1130_v43 = vld [vmem:[%s3271_s3 + $0x320] sm:$0xff]  ;;  %v1097_v45 = vld [vmem:[%s3271_s3 + $0x218] sm:$0xff]  ;;  %v1112_v48 = vld [vmem:[%s3271_s3 + $0x290] sm:$0xff] }
 0x2ca   :  { %1807 = vmatprep.subr.mxu1 %v1156_v56  ;;  %1503 = vmatprep.mubr.f32.mxu1 %v1025_v3  ;;  %v1129_v46 = vld [vmem:[%s3271_s3 + $0x318] sm:$0xff]  ;;  %v1144_v49 = vld [vmem:[%s3271_s3 + $0x390] sm:$0xff]  ;;  %v1111_v55 = vld [vmem:[%s3271_s3 + $0x288] sm:$0xff]  ;;  %v1693_v3 = vrot.slane %v2842_v35, 10 }
 0x2cb   :  { %1773 = vmatpush3.msra.mxu0 %v1108_v61  ;;  %1808 = vmatpush3.msra.mxu1 %v1140_v62  ;;  %v1096_v53 = vld [vmem:[%s3271_s3 + $0x210] sm:$0xff]  ;;  %v1143_v56 = vld [vmem:[%s3271_s3 + $0x388] sm:$0xff]  ;;  %v1110_v61 = vld [vmem:[%s3271_s3 + $0x280] sm:$0xff] }
 0x2cc   :  { %1774 = vmatprep.subr.mxu0 %v1123_v4  ;;  %1809 = vmatprep.subr.mxu1 %v1155_v37  ;;  %v1128_v54 = vld [vmem:[%s3271_s3 + $0x310] sm:$0xff]  ;;  %v1095_v58 = vld [vmem:[%s3271_s3 + $0x208] sm:$0xff]  ;;  %v1142_v62 = vld [vmem:[%s3271_s3 + $0x380] sm:$0xff] }
 0x2cd   :  { %1775 = vmatpush3.msra.mxu0 %v1107_v47  ;;  %1810 = vmatpush3.msra.mxu1 %v1139_v5  ;;  %v1127_v60 = vld [vmem:[%s3271_s3 + $0x308] sm:$0xff]  ;;  %v1094_v4 = vld [vmem:[%s3271_s3 + $0x200] sm:$0xff]  ;;  %v974_v47 = vrot.slane %v2834_v27, 4  ;;  %v1696_v5 = vrot.slane %v2836_v28, 11  ;;  %v1189_v34 = vld [vmem:[%s3271_s3 + $0x4f8] sm:$0xff] }
 0x2ce   :  { %1776 = vmatprep.subr.mxu0 %v1122_v17  ;;  %1811 = vmatprep.subr.mxu1 %v1154_v31  ;;  %v1126_v37 = vld [vmem:[%s3271_s3 + $0x300] sm:$0xff]  ;;  %v1221_v35 = vld [vmem:[%s3271_s3 + $0x5f8] sm:$0xff]  ;;  %v978_v17 = vrot.slane %v2834_v27, 5  ;;  %v1698_v31 = vrot.slane %v2836_v28, 12  ;;  %v1188_v28 = vld [vmem:[%s3271_s3 + $0x4f0] sm:$0xff] }
 0x2cf   :  { %1777 = vmatpush3.msra.mxu0 %v1106_v51  ;;  %1812 = vmatpush3.msra.mxu1 %v1138_v6  ;;  %v1022_v51 = vsel %vm1017_vm3, %v965_v63, %v1691_v0  ;;  %v1024_v6 = vsel %vm1017_vm3, %v969_v2, %v1693_v3  ;;  %v1027_v27 = vsel %vm1017_vm3, %v974_v47, %v1696_v5  ;;  %v1177_v63 = vld [vmem:[%s3271_s3 + $0x498] sm:$0xff]  ;;  %v1160_v47 = vld [vmem:[%s3271_s3 + $0x410] sm:$0xff] }
 0x2d0   :  { %1778 = vmatprep.subr.mxu0 %v1121_v59  ;;  %1813 = vmatprep.subr.mxu1 %v1153_v8  ;;  %v1173_v59 = vld [vmem:[%s3271_s3 + $0x478] sm:$0xff]  ;;  %v1192_v5 = vld [vmem:[%s3271_s3 + $0x510] sm:$0xff] }
 0x2d1   :  { %1779 = vmatpush3.msra.mxu0 %v1105_v36  ;;  %1814 = vmatpush3.msra.mxu1 %v1137_v9  ;;  %v1205_v8 = vld [vmem:[%s3271_s3 + $0x578] sm:$0xff]  ;;  %v1220_v36 = vld [vmem:[%s3271_s3 + $0x5f0] sm:$0xff]  ;;  %v1029_v9 = vsel %vm1017_vm3, %v978_v17, %v1698_v31  ;;  %v1159_v17 = vld [vmem:[%s3271_s3 + $0x408] sm:$0xff] }
 0x2d2   :  { %1780 = vmatprep.subr.mxu0 %v1120_v42  ;;  %1815 = vmatprep.subr.mxu1 %v1152_v11  ;;  %v1172_v42 = vld [vmem:[%s3271_s3 + $0x470] sm:$0xff]  ;;  %v1209_v0 = vld [vmem:[%s3271_s3 + $0x598] sm:$0xff]  ;;  %v1191_v31 = vld [vmem:[%s3271_s3 + $0x508] sm:$0xff] }
 0x2d3   :  { %1781 = vmatpush3.msra.mxu0 %v1104_v50  ;;  %1816 = vmatpush3.msra.mxu1 %v1136_v12  ;;  %v1204_v11 = vld [vmem:[%s3271_s3 + $0x570] sm:$0xff]  ;;  %v1187_v50 = vld [vmem:[%s3271_s3 + $0x4e8] sm:$0xff]  ;;  %v1161_v2 = vld [vmem:[%s3271_s3 + $0x418] sm:$0xff] }
 0x2d4   :  { %1782 = vmatprep.subr.mxu0 %v1119_v1  ;;  %1817 = vmatprep.subr.mxu1 %v1151_v13  ;;  %v1219_v12 = vld [vmem:[%s3271_s3 + $0x5e8] sm:$0xff]  ;;  %v1193_v3 = vld [vmem:[%s3271_s3 + $0x518] sm:$0xff] }
 0x2d5   :  { %1783 = vmatpush3.msra.mxu0 %v1103_v14  ;;  %1818 = vmatpush3.msra.mxu1 %v1135_v10  ;;  %v1171_v1 = vld [vmem:[%s3271_s3 + $0x468] sm:$0xff]  ;;  %v1186_v14 = vld [vmem:[%s3271_s3 + $0x4e0] sm:$0xff] }
 0x2d6   :  { %1784 = vmatprep.subr.mxu0 %v1118_v15  ;;  %1819 = vmatprep.subr.mxu1 %v1150_v25  ;;  %v1203_v13 = vld [vmem:[%s3271_s3 + $0x568] sm:$0xff]  ;;  %v1218_v10 = vld [vmem:[%s3271_s3 + $0x5e0] sm:$0xff] }
 0x2d7   :  { %1785 = vmatpush3.msra.mxu0 %v1102_v16  ;;  %1820 = vmatpush3.msra.mxu1 %v1134_v44  ;;  %v1170_v15 = vld [vmem:[%s3271_s3 + $0x460] sm:$0xff]  ;;  %v1185_v16 = vld [vmem:[%s3271_s3 + $0x4d8] sm:$0xff] }
 0x2d8   :  { %1786 = vmatprep.subr.mxu0 %v1117_v18  ;;  %1821 = vmatprep.subr.mxu1 %v1149_v52  ;;  %v1202_v25 = vld [vmem:[%s3271_s3 + $0x560] sm:$0xff]  ;;  %v1217_v44 = vld [vmem:[%s3271_s3 + $0x5d8] sm:$0xff] }
 0x2d9   :  { %1787 = vmatpush3.msra.mxu0 %v1101_v19  ;;  %1822 = vmatpush3.msra.mxu1 %v1133_v20  ;;  %v1169_v18 = vld [vmem:[%s3271_s3 + $0x458] sm:$0xff]  ;;  %v1184_v19 = vld [vmem:[%s3271_s3 + $0x4d0] sm:$0xff] }
 0x2da   :  { %1788 = vmatprep.subr.mxu0 %v1116_v22  ;;  %1823 = vmatprep.subr.mxu1 %v1148_v23  ;;  %v1201_v52 = vld [vmem:[%s3271_s3 + $0x558] sm:$0xff]  ;;  %v1216_v20 = vld [vmem:[%s3271_s3 + $0x5d0] sm:$0xff] }
 0x2db   :  { %1789 = vmatpush3.msra.mxu0 %v1100_v24  ;;  %1824 = vmatpush3.msra.mxu1 %v1132_v26  ;;  %v1168_v22 = vld [vmem:[%s3271_s3 + $0x450] sm:$0xff]  ;;  %v1183_v24 = vld [vmem:[%s3271_s3 + $0x4c8] sm:$0xff] }
 0x2dc   :  { %1790 = vmatprep.subr.mxu0 %v1115_v29  ;;  %1825 = vmatprep.subr.mxu1 %v1147_v30  ;;  %v1200_v23 = vld [vmem:[%s3271_s3 + $0x550] sm:$0xff]  ;;  %v1215_v26 = vld [vmem:[%s3271_s3 + $0x5c8] sm:$0xff] }
 0x2dd   :  { %1791 = vmatpush3.msra.mxu0 %v1099_v32  ;;  %1826 = vmatpush3.msra.mxu1 %v1131_v33  ;;  %v1167_v29 = vld [vmem:[%s3271_s3 + $0x448] sm:$0xff]  ;;  %v1182_v32 = vld [vmem:[%s3271_s3 + $0x4c0] sm:$0xff] }
 0x2de   :  { %1792 = vmatprep.subr.mxu0 %v1114_v21  ;;  %1827 = vmatprep.subr.mxu1 %v1146_v39  ;;  %v1199_v30 = vld [vmem:[%s3271_s3 + $0x548] sm:$0xff]  ;;  %v1214_v33 = vld [vmem:[%s3271_s3 + $0x5c0] sm:$0xff] }
 0x2df   :  { %1793 = vmatpush3.msra.mxu0 %v1098_v41  ;;  %1828 = vmatpush3.msra.mxu1 %v1130_v43  ;;  %v1166_v21 = vld [vmem:[%s3271_s3 + $0x440] sm:$0xff]  ;;  %v1181_v41 = vld [vmem:[%s3271_s3 + $0x4b8] sm:$0xff] }
 0x2e0   :  { %1794 = vmatprep.subr.mxu0 %v1113_v40  ;;  %1829 = vmatprep.subr.mxu1 %v1145_v38  ;;  %v1198_v39 = vld [vmem:[%s3271_s3 + $0x540] sm:$0xff]  ;;  %v1213_v43 = vld [vmem:[%s3271_s3 + $0x5b8] sm:$0xff] }
 0x2e1   :  { %1795 = vmatpush3.msra.mxu0 %v1097_v45  ;;  %1830 = vmatpush3.msra.mxu1 %v1129_v46  ;;  %v1165_v40 = vld [vmem:[%s3271_s3 + $0x438] sm:$0xff]  ;;  %v1180_v45 = vld [vmem:[%s3271_s3 + $0x4b0] sm:$0xff] }
 0x2e2   :  { %1796 = vmatprep.subr.mxu0 %v1112_v48  ;;  %1831 = vmatprep.subr.mxu1 %v1144_v49  ;;  %v1197_v38 = vld [vmem:[%s3271_s3 + $0x538] sm:$0xff]  ;;  %v1212_v46 = vld [vmem:[%s3271_s3 + $0x5b0] sm:$0xff] }
 0x2e3   :  { %1797 = vmatpush3.msra.mxu0 %v1096_v53  ;;  %1832 = vmatpush3.msra.mxu1 %v1128_v54  ;;  %v1164_v48 = vld [vmem:[%s3271_s3 + $0x430] sm:$0xff]  ;;  %v1179_v53 = vld [vmem:[%s3271_s3 + $0x4a8] sm:$0xff] }
 0x2e4   :  { %1798 = vmatprep.subr.mxu0 %v1111_v55  ;;  %1833 = vmatprep.subr.mxu1 %v1143_v56  ;;  %v1196_v49 = vld [vmem:[%s3271_s3 + $0x530] sm:$0xff]  ;;  %v1211_v54 = vld [vmem:[%s3271_s3 + $0x5a8] sm:$0xff] }
 0x2e5   :  { %1799 = vmatpush3.msra.mxu0 %v1095_v58  ;;  %1834 = vmatpush3.msra.mxu1 %v1127_v60  ;;  %v1163_v55 = vld [vmem:[%s3271_s3 + $0x428] sm:$0xff]  ;;  %v1178_v58 = vld [vmem:[%s3271_s3 + $0x4a0] sm:$0xff] }
 0x2e6   :  { %1800 = vmatprep.subr.mxu0 %v1110_v61  ;;  %1835 = vmatprep.subr.mxu1 %v1142_v62  ;;  %v1195_v56 = vld [vmem:[%s3271_s3 + $0x528] sm:$0xff]  ;;  %v1210_v60 = vld [vmem:[%s3271_s3 + $0x5a0] sm:$0xff] }
 0x2e7   :  { %1801 = vmatpush3.msra.mxu0 %v1094_v4  ;;  %1836 = vmatpush3.msra.mxu1 %v1126_v37  ;;  %v1162_v61 = vld [vmem:[%s3271_s3 + $0x420] sm:$0xff]  ;;  %v1176_v4 = vld [vmem:[%s3271_s3 + $0x490] sm:$0xff] }
 0x2e8   :  { %1434 = vmatmul.mubr.f32.vlgmr.msra.gmra.mxu0 %v1022_v51  ;;  %1504 = vmatmul.mubr.f32.vlgmr.msra.gmra.mxu1 %v1024_v6  ;;  %v1194_v62 = vld [vmem:[%s3271_s3 + $0x520] sm:$0xff]  ;;  %v1208_v37 = vld [vmem:[%s3271_s3 + $0x590] sm:$0xff] }
 0x2e9   :  { %1840 = vmatprep.subr.mxu0 %v1189_v34  ;;  %1875 = vmatprep.subr.mxu1 %v1221_v35  ;;  %v1175_v34 = vld [vmem:[%s3271_s3 + $0x488] sm:$0xff]  ;;  %v1174_v51 = vld [vmem:[%s3271_s3 + $0x480] sm:$0xff] }
 0x2ea   :  { %1841 = vmatpush3.msra.mxu0 %v1173_v59  ;;  %1573 = vmatprep.mubr.f32.mxu0 %v1027_v27  ;;  %v1207_v35 = vld [vmem:[%s3271_s3 + $0x588] sm:$0xff]  ;;  %v1206_v6 = vld [vmem:[%s3271_s3 + $0x580] sm:$0xff] }
 0x2eb   :  { %1876 = vmatpush3.msra.mxu1 %v1205_v8  ;;  %1643 = vmatprep.mubr.f32.mxu1 %v1029_v9  ;;  %v1158_v59 = vld [vmem:[%s3271_s3 + $0x400] sm:$0xff] }
 0x2ec   :  { %1842 = vmatprep.subr.mxu0 %v1188_v28  ;;  %1877 = vmatprep.subr.mxu1 %v1220_v36  ;;  %v1190_v8 = vld [vmem:[%s3271_s3 + $0x500] sm:$0xff]  ;;  %s1945_s3 = smov [#allocation2]  }
 0x2ed   :  { %1843 = vmatpush3.msra.mxu0 %v1172_v42  ;;  %1878 = vmatpush3.msra.mxu1 %v1204_v11  ;;  %v1699_v11 = vld [vmem:[%s3272_s4] ss:$0 sm:$0xff]  ;;  %s1657_s27 = sshll.u32 %s1945_s3, 4  ;;  %s1658_s27 = int_to_ptr.vmem [resolvable:$true] %s1657_s27 }
 0x2ee   :  { %1844 = vmatprep.subr.mxu0 %v1187_v50  ;;  %1879 = vmatprep.subr.mxu1 %v1219_v12  ;;  %s1919_s4 = scalar_lea.vmem %s1658_s27, 32  ;;  %p1924_p1 = scmp.lt.s32.totalorder %s1658_s27, %s1658_s27 }
 0x2ef   :  { %1845 = vmatpush3.msra.mxu0 %v1171_v1  ;;  %1880 = vmatpush3.msra.mxu1 %v1203_v13  ;;  %p1920_p0 = scmp.ne.s32.totalorder %s1658_s27, %s1919_s4  ;;  %p1925_p2 = scmp.lt.s32.totalorder %s1919_s4, %s1919_s4 }
 0x2f0   :  { %1846 = vmatprep.subr.mxu0 %v1186_v14  ;;  %1881 = vmatprep.subr.mxu1 %v1218_v10 }
 0x2f1   :  { %1847 = vmatpush3.msra.mxu0 %v1170_v15  ;;  %1882 = vmatpush3.msra.mxu1 %v1202_v25  ;;  %p1926_p3 = por %p1925_p2, %p1924_p1 }
 0x2f2   :  { %1848 = vmatprep.subr.mxu0 %v1185_v16  ;;  %1883 = vmatprep.subr.mxu1 %v1217_v44 }
 0x2f3   :  { %1849 = vmatpush3.msra.mxu0 %v1169_v18  ;;  %1884 = vmatpush3.msra.mxu1 %v1201_v52  ;;  %p1927_p4 = pnand %p1926_p3, %p1920_p0 }
 0x2f4   :  { %1850 = vmatprep.subr.mxu0 %v1184_v19  ;;  %1885 = vmatprep.subr.mxu1 %v1216_v20 }
 0x2f5   :  { %1851 = vmatpush3.msra.mxu0 %v1168_v22  ;;  %1886 = vmatpush3.msra.mxu1 %v1200_v23 }
 0x2f6   :  { %1852 = vmatprep.subr.mxu0 %v1183_v24  ;;  %1887 = vmatprep.subr.mxu1 %v1215_v26 }
 0x2f7   :  { %1853 = vmatpush3.msra.mxu0 %v1167_v29  ;;  %1888 = vmatpush3.msra.mxu1 %v1199_v30 }
 0x2f8   :  { %1854 = vmatprep.subr.mxu0 %v1182_v32  ;;  %1889 = vmatprep.subr.mxu1 %v1214_v33 }
 0x2f9   :  { %1855 = vmatpush3.msra.mxu0 %v1166_v21  ;;  %1890 = vmatpush3.msra.mxu1 %v1198_v39 }
 0x2fa   :  { %1856 = vmatprep.subr.mxu0 %v1181_v41  ;;  %1891 = vmatprep.subr.mxu1 %v1213_v43 }
 0x2fb   :  { %1857 = vmatpush3.msra.mxu0 %v1165_v40  ;;  %1892 = vmatpush3.msra.mxu1 %v1197_v38 }
 0x2fc   :  { %1858 = vmatprep.subr.mxu0 %v1180_v45  ;;  %1893 = vmatprep.subr.mxu1 %v1212_v46 }
 0x2fd   :  { %1859 = vmatpush3.msra.mxu0 %v1164_v48  ;;  %1894 = vmatpush3.msra.mxu1 %v1196_v49 }
 0x2fe   :  { %1860 = vmatprep.subr.mxu0 %v1179_v53  ;;  %1895 = vmatprep.subr.mxu1 %v1211_v54 }
 0x2ff   :  { %1861 = vmatpush3.msra.mxu0 %v1163_v55  ;;  %1896 = vmatpush3.msra.mxu1 %v1195_v56 }
 0x300   :  { %1862 = vmatprep.subr.mxu0 %v1178_v58  ;;  %1897 = vmatprep.subr.mxu1 %v1210_v60 }
 0x301   :  { %1863 = vmatpush3.msra.mxu0 %v1162_v61  ;;  %1898 = vmatpush3.msra.mxu1 %v1194_v62 }
 0x302   :  { %1864 = vmatprep.subr.mxu0 %v1177_v63  ;;  %1899 = vmatprep.subr.mxu1 %v1209_v0 }
 0x303   :  { %1865 = vmatpush3.msra.mxu0 %v1161_v2  ;;  %1900 = vmatpush3.msra.mxu1 %v1193_v3 }
 0x304   :  { %1866 = vmatprep.subr.mxu0 %v1176_v4  ;;  %1901 = vmatprep.subr.mxu1 %v1208_v37 }
 0x305   :  { %1867 = vmatpush3.msra.mxu0 %v1160_v47  ;;  %1902 = vmatpush3.msra.mxu1 %v1192_v5 }
 0x306   :  { %1868 = vmatprep.subr.mxu0 %v1175_v34  ;;  %1903 = vmatprep.subr.mxu1 %v1207_v35 }
 0x307   :  { %1869 = vmatpush3.msra.mxu0 %v1159_v17  ;;  %1904 = vmatpush3.msra.mxu1 %v1191_v31 }
 0x308   :  { %1870 = vmatprep.subr.mxu0 %v1174_v51  ;;  %1905 = vmatprep.subr.mxu1 %v1206_v6 }
 0x309   :  { %1871 = vmatpush3.msra.mxu0 %v1158_v59  ;;  %1906 = vmatpush3.msra.mxu1 %v1190_v8 }
 0x30a   :  { %1574 = vmatmul.mubr.f32.vlgmr.msra.gmra.mxu0 %v2895_v57  ;;  %1644 = vmatmul.mubr.f32.vlgmr.msra.gmra.mxu1 %v2898_v7 }
 0x387   :  { %v1732_v27 = vpop.f32.mrf.mxu0  ;;  %v1767_v36 = vpop.f32.mrf.mxu1 }
 0x389   :  { %v1733_v28 = vpop.f32.mrf.mxu0  ;;  %v1768_v50 = vpop.f32.mrf.mxu1 }
 0x38a   :  { %v1734_v42 = vadd.f32 %v1733_v28, %v1732_v27  ;;  %v1769_v14 = vadd.f32 %v1768_v50, %v1767_v36 }
 0x38c   :  { %v1296_v1 = vadd.f32 %v1734_v42, %v1699_v11 }
 0x38e   :  { %v1366_v15 = vadd.f32 %v1769_v14, %v1296_v1 }
 0x3a8   :  { %v1802_v9 = vpop.f32.mrf.mxu0  ;;  %v1837_v13 = vpop.f32.mrf.mxu1 }
 0x3aa   :  { %v1803_v12 = vpop.f32.mrf.mxu0  ;;  %v1838_v25 = vpop.f32.mrf.mxu1 }
 0x3ab   :  { %v1804_v10 = vadd.f32 %v1803_v12, %v1802_v9  ;;  %v1839_v44 = vadd.f32 %v1838_v25, %v1837_v13 }
 0x3ad   :  { %v1436_v57 = vadd.f32 %v1804_v10, %v1366_v15 }
 0x3af   :  { %v1506_v19 = vadd.f32 %v1839_v44, %v1436_v57 }
 0x3ca   :  { %v1872_v16 = vpop.f32.mrf.mxu0  ;;  %v1907_v7 = vpop.f32.mrf.mxu1 }
 0x3cc   :  { %v1873_v18 = vpop.f32.mrf.mxu0  ;;  %v1908_v52 = vpop.f32.mrf.mxu1 }
 0x3cd   :  { %v1874_v20 = vadd.f32 %v1873_v18, %v1872_v16  ;;  %v1909_v23 = vadd.f32 %v1908_v52, %v1907_v7 }
 0x3cf   :  { %v1576_v22 = vadd.f32 %v1874_v20, %v1506_v19 }
 0x3d1   :  { %v1646_v24 = vadd.f32 %v1909_v23, %v1576_v22 }
 0x3d3   :  { %1650 = vst.msk [vmem:[#allocation2] sm:$0x3] %vm1649_vm4, %v1646_v24 }
 0x3d4   :  { %1930 = shalt.err (!%p1927_p4)
}
 0x3d5   :  { %1660 = dma.vmem_to_hbm [thread:$0]  %s1658_s27, 32, %s3273_s5, [#allocation3]  }
 0x3d6   :  { %1939 = dma.done.wait [#allocation3], 32  }
 0x3d7   :  { %1940 = vsyncadd [#allocation3], 4294967264 }
 0x3d8   :  { %1664 = vsyncpa [#allocation3], 1 }

</bundles_post_ra>
